<compile_context>
chip_gen: v7x
topology: tpu7x:2x2x1
jax: 0.10.0
libtpu: 0.0.40
codegen_flags: <defaults>
</compile_context>

<pallas_src>
import functools

import jax
import jax.numpy as jnp
from jax.experimental import pallas as pl
from jax.experimental.pallas import tpu as pltpu


def _round_up(v, m):
    return ((v + m - 1) // m) * m


def _gelu_tanh(x):
    # tanh approximation of GELU (EUP tanh). Max |err| vs exact erf ~1e-3.
    dt = x.dtype
    c0 = jnp.asarray(0.7978845608028654, dt)   # sqrt(2/pi)
    c1 = jnp.asarray(0.044715, dt)
    half = jnp.asarray(0.5, dt)
    one = jnp.asarray(1.0, dt)
    return half * x * (one + jnp.tanh(c0 * (x + c1 * x * x * x)))


def _erf_f32(x):
    # Rational approximation of erf for float32 (Eigen/XLA coefficients).
    x = jnp.clip(x, -4.0, 4.0)
    x2 = x * x
    p = jnp.float32(-2.72614225801306e-10)
    p = p * x2 + jnp.float32(2.77068142495902e-08)
    p = p * x2 + jnp.float32(-2.10102402082508e-06)
    p = p * x2 + jnp.float32(-5.69250639462346e-05)
    p = p * x2 + jnp.float32(-7.34990630326855e-04)
    p = p * x2 + jnp.float32(-2.95459980854025e-03)
    p = p * x2 + jnp.float32(-1.60960333262415e-02)
    p = p * x
    q = jnp.float32(-1.45660718464996e-05)
    q = q * x2 + jnp.float32(-2.13374055278905e-04)
    q = q * x2 + jnp.float32(-1.68282697438203e-03)
    q = q * x2 + jnp.float32(-7.37332916720468e-03)
    q = q * x2 + jnp.float32(-1.42647390514189e-02)
    return p / q


def _gelu_exact(x):
    # nn.GELU() default (approximate='none'): 0.5*x*(1+erf(x/sqrt(2))).
    x = x.astype(jnp.float32)
    return 0.5 * x * (1.0 + _erf_f32(x * jnp.float32(0.7071067811865476)))


def _parallel_convnext_kernel(kernel_sizes, dilation, maxpad, halo, h_chunk,
                              eps, exact_gelu, gelu_dtype,
                              xa_ref, xb_ref, *rest):
    # rest = [9 param refs per block ...] + [o_ref] + [win_ref scratch]
    *prefs, o_ref, win_ref = rest
    n_blocks = len(kernel_sizes)
    assert len(prefs) == 9 * n_blocks

    TT = o_ref.shape[1]
    C = o_ref.shape[2]
    f32 = jnp.float32
    gelu = _gelu_exact if exact_gelu else _gelu_tanh

    # Assemble the conv window in f32 scratch:
    #   rows [0, TT)        <- this tile's block of the left-padded input
    #   rows [TT, TT+halo)  <- right halo (first `halo` rows of next HALO8 slab)
    # Every scratch row read below is written first, so no memset is needed.
    win_ref[pl.ds(0, TT), :] = xa_ref[0].astype(f32)
    if halo > 0:
        win_ref[pl.ds(TT, halo), :] = xb_ref[0, :halo, :].astype(f32)

    # Residual term: the un-convolved x tile sits at window rows
    # [maxpad, maxpad + TT) of the left-padded input.
    total = win_ref[pl.ds(maxpad, TT), :]                # (TT, C) f32

    for b, ksz in enumerate(kernel_sizes):
        (dww, dwb, lnw, lnb, w1, b1, w2, b2, gmm) = prefs[9 * b: 9 * (b + 1)]
        pad_b = (dilation * (ksz - 1)) // 2
        base = maxpad - pad_b

        # ---- depthwise Conv1d (groups=dim, 'same' padding), taps unrolled --
        acc = jnp.broadcast_to(dwb[...], (TT, C)).astype(f32)
        for i in range(ksz):
            off = base + i * dilation
            acc = acc + win_ref[pl.ds(off, TT), :] * dww[pl.ds(i, 1), :]

        # ---- LayerNorm over channels (channels_last, biased variance) ------
        mu = jnp.mean(acc, axis=-1, keepdims=True)
        d = acc - mu
        var = jnp.mean(d * d, axis=-1, keepdims=True)
        xn = d * jax.lax.rsqrt(var + jnp.float32(eps))
        xn = xn * lnw[...] + lnb[...]
        xn_mm = xn.astype(w1.dtype)                      # bf16 for the MXU

        # ---- pointwise MLP (full hidden dim by default: one matmul pair) ---
        hidden = w1.shape[1]
        hc = min(h_chunk, hidden)
        if hc >= hidden:
            h = jnp.dot(xn_mm, w1[...], preferred_element_type=f32) + b1[...]
            g = gelu(h.astype(gelu_dtype)).astype(w2.dtype)
            y = jnp.dot(g, w2[...], preferred_element_type=f32)
        else:
            y = jnp.zeros((TT, C), f32)
            for c0 in range(0, hidden, hc):
                cw = min(hc, hidden - c0)
                h = jnp.dot(xn_mm, w1[:, pl.ds(c0, cw)],
                            preferred_element_type=f32)
                h = h + b1[:, pl.ds(c0, cw)]
                g = gelu(h.astype(gelu_dtype)).astype(w2.dtype)
                y = y + jnp.dot(g, w2[pl.ds(c0, cw), :],
                                preferred_element_type=f32)

        # layer scale + accumulate into the parallel-block sum
        total = total + (y + b2[...]) * gmm[...]

    o_ref[0] = total.astype(o_ref.dtype)


def _tpu_vmem_capacity_bytes():
    """Best-effort per-core VMEM capacity; None if unknown."""
    try:
        cap = int(pltpu.get_tpu_info().vmem_capacity_bytes)
        if cap > 0:
            return cap
    except Exception:
        pass
    try:
        kind = jax.devices()[0].device_kind.lower()
    except Exception:
        return None
    if "v7" in kind:
        return 64 << 20
    if "v5" in kind or "v6" in kind:
        return 128 << 20
    return None


def parallel_convnext_block(x, blocks_params, kernel_sizes, dilation=1,
                            eps=1e-6, time_tile=None, h_chunk=None,
                            use_bf16_matmul=True, exact_gelu=False,
                            gelu_in_bf16=False, channels_last=False):
    """ParallelConvNeXtBlock.forward.

    x: (N, C, T) PyTorch Conv1d layout by default, or (N, T, C) if
    channels_last=True (skips the edge transposes).
    """
    if channels_last:
        N, T, C = x.shape
        x_tc = x
    else:
        N, C, T = x.shape
        x_tc = jnp.transpose(x, (0, 2, 1))                # (N, T, C)

    n_blocks = len(kernel_sizes)
    assert len(blocks_params) == n_blocks and n_blocks >= 1

    pads = []
    for ksz in kernel_sizes:
        # 'same'-length Conv1d requires dilation*(K-1) even (odd K for dil=1).
        assert (dilation * (ksz - 1)) % 2 == 0, "need odd kernel (same-pad conv)"
        pads.append((dilation * (ksz - 1)) // 2)
    maxpad = max(pads)
    halo = 2 * maxpad
    HALO8 = _round_up(max(halo, 1), 8)          # halo slab rows (>=8, % 8 == 0)

    hidden = blocks_params[0]["w1"].shape[1]
    for p in blocks_params:
        assert p["w1"].shape == (C, hidden) and p["w2"].shape == (hidden, C)
    hc = hidden if h_chunk is None else max(1, min(int(h_chunk), hidden))

    # ---- generation-aware VMEM budget & time tiling ----------------------
    cap = _tpu_vmem_capacity_bytes()
    if time_tile is None:
        time_tile = 512 if (cap is not None and cap >= (100 << 20)) else 256
    TT = min(int(time_tile), _round_up(T, 8))
    TT = max(TT, HALO8)
    TT = _round_up(TT, HALO8)                   # TT % HALO8 == 0 (and % 8 == 0)
    n_tiles = -(-T // TT)
    halo_blocks_per_tile = TT // HALO8

    vmem_limit = None
    if cap is not None:
        # Never request the full physical VMEM; leave compiler headroom.
        vmem_limit = int(min(cap - (8 << 20), int(cap * 0.85)))

    # ---- channels-last, left pad by maxpad (conv zero pad); small right pad
    # so the last tile's HALO8 halo slab stays in bounds.
    t_padded = n_tiles * TT + HALO8
    xp = jnp.pad(x_tc, ((0, 0), (maxpad, t_padded - maxpad - T), (0, 0)))

    # ---- parameters (per block, 2-D, matmul weights optionally bf16) -----
    mm_dtype = jnp.bfloat16 if use_bf16_matmul else jnp.float32
    f32 = jnp.float32
    param_arrays = []
    for p in blocks_params:
        param_arrays += [
            p["dw_w"].astype(f32).reshape(-1, C),    # (K, C)
            p["dw_b"].astype(f32).reshape(1, C),
            p["ln_w"].astype(f32).reshape(1, C),
            p["ln_b"].astype(f32).reshape(1, C),
            p["w1"].astype(mm_dtype),                # (C, H)
            p["b1"].astype(f32).reshape(1, hidden),
            p["w2"].astype(mm_dtype),                # (H, C)
            p["b2"].astype(f32).reshape(1, C),
            p["gamma"].astype(f32).reshape(1, C),
        ]

    gelu_dtype = (jnp.bfloat16 if (gelu_in_bf16 and not exact_gelu)
                  else jnp.float32)

    kernel = functools.partial(
        _parallel_convnext_kernel,
        tuple(int(k) for k in kernel_sizes), int(dilation), int(maxpad),
        int(halo), int(hc), float(eps), bool(exact_gelu), gelu_dtype)

    # x is passed twice: its (1,TT,C) tile and a (1,HALO8,C) right-halo slab.
    x_a_spec = pl.BlockSpec((1, TT, C), lambda n, j: (n, j, 0))
    x_b_spec = pl.BlockSpec((1, HALO8, C),
                            lambda n, j: (n, (j + 1) * halo_blocks_per_tile, 0))
    out_spec = pl.BlockSpec((1, TT, C), lambda n, j: (n, j, 0))

    # Advisory cost estimate for XLA's scheduler.
    flops = 4 * N * n_tiles * TT * C * hidden * n_blocks        # two matmuls
    flops += 2 * N * n_tiles * TT * C * int(sum(kernel_sizes))  # dwconv taps
    transc = N * n_tiles * TT * hidden * n_blocks                # GELU tanh
    bytes_acc = int(xp.size) * xp.dtype.itemsize
    bytes_acc += N * n_tiles * TT * C * x_tc.dtype.itemsize
    bytes_acc += sum(int(p.size) * p.dtype.itemsize for p in param_arrays)
    cost = pl.CostEstimate(flops=int(flops), transcendentals=int(transc),
                           bytes_accessed=int(bytes_acc))

    cp_kwargs = dict(dimension_semantics=("parallel", "parallel"))
    if vmem_limit is not None:
        cp_kwargs["vmem_limit_bytes"] = vmem_limit
    compiler_params = pltpu.CompilerParams(**cp_kwargs)

    def _run(single_buffer_params):
        def _pspec(p):
            idx = lambda n, j, _nd=p.ndim: (0,) * _nd
            if single_buffer_params:
                # Constant-index params: single-buffer to halve resident VMEM.
                return pl.BlockSpec(p.shape, idx, pipeline_mode=pl.Buffered(1))
            return pl.BlockSpec(p.shape, idx)

        grid_spec = pltpu.PrefetchScalarGridSpec(
            num_scalar_prefetch=0,
            grid=(N, n_tiles),
            in_specs=[x_a_spec, x_b_spec] + [_pspec(p) for p in param_arrays],
            out_specs=out_spec,
            scratch_shapes=[pltpu.VMEM((TT + HALO8, C), jnp.float32)],
        )
        return pl.pallas_call(
            kernel,
            out_shape=jax.ShapeDtypeStruct((N, n_tiles * TT, C), x_tc.dtype),
            grid_spec=grid_spec,
            compiler_params=compiler_params,
            cost_estimate=cost,
        )(xp, xp, *param_arrays)

    try:
        out = _run(True)      # single-buffered constant params
    except Exception:
        out = _run(False)     # fall back to default double-buffering

    out = out[:, :T, :]                                  # drop T padding
    return out if channels_last else jnp.transpose(out, (0, 2, 1))


def init_block_params(key, dim, kernel_size, mlp_ratio=4.0,
                      layer_scale_init_value=1e-6, dtype=jnp.float32):
    """Deterministic synthetic parameters matching the module's shapes.

    Mapping from torch: dwconv.weight (dim,1,K) -> dw_w (K, dim);
    Linear weights (out,in) are stored transposed as (in, out).
    """
    hidden = int(mlp_ratio * dim)
    ks = jax.random.split(key, 6)
    return dict(
        dw_w=jax.random.normal(ks[0], (kernel_size, dim), dtype) * 0.2,
        dw_b=jax.random.normal(ks[1], (1, dim), dtype) * 0.1,
        ln_w=jnp.ones((1, dim), dtype),
        ln_b=jnp.zeros((1, dim), dtype),
        w1=jax.random.normal(ks[2], (dim, hidden), dtype) * (1.0 / dim ** 0.5),
        b1=jax.random.normal(ks[3], (1, hidden), dtype) * 0.1,
        w2=jax.random.normal(ks[4], (hidden, dim), dtype) * (1.0 / hidden ** 0.5),
        b2=jax.random.normal(ks[5], (1, dim), dtype) * 0.1,
        gamma=jnp.full((1, dim), layer_scale_init_value, dtype),
    )


if __name__ == "__main__":
    key = jax.random.PRNGKey(0)
    N, C, T = 2, 4, 16                 # batch, dim (channels), time
    kernel_sizes = [7, 3]
    mlp_ratio = 4.0

    k_x, k_p = jax.random.split(key)
    x = jax.random.normal(k_x, (N, C, T), jnp.float32)     # PyTorch NCT layout
    block_keys = jax.random.split(k_p, len(kernel_sizes))
    blocks_params = [init_block_params(bk, C, ks, mlp_ratio)
                     for bk, ks in zip(block_keys, kernel_sizes)]

    y = parallel_convnext_block(x, blocks_params, kernel_sizes)
    y = jax.block_until_ready(y)
    assert y.shape == (N, C, T) and y.dtype == x.dtype
    assert bool(jnp.isfinite(y).all())
    print("KERNEL_OK")
</pallas_src>

<mosaic_0001>
module attributes {stable_mosaic.version = 11 : i64} {
  func.func @_parallel_convnext_kernel(%arg0: i32, %arg1: i32, %arg2: memref<1x16x4xf32, #tpu.memory_space<vmem>>, %arg3: memref<1x8x4xf32, #tpu.memory_space<vmem>>, %arg4: memref<7x4xf32, #tpu.memory_space<vmem>>, %arg5: memref<1x4xf32, #tpu.memory_space<vmem>>, %arg6: memref<1x4xf32, #tpu.memory_space<vmem>>, %arg7: memref<1x4xf32, #tpu.memory_space<vmem>>, %arg8: memref<4x16xbf16, #tpu.memory_space<vmem>>, %arg9: memref<1x16xf32, #tpu.memory_space<vmem>>, %arg10: memref<16x4xbf16, #tpu.memory_space<vmem>>, %arg11: memref<1x4xf32, #tpu.memory_space<vmem>>, %arg12: memref<1x4xf32, #tpu.memory_space<vmem>>, %arg13: memref<3x4xf32, #tpu.memory_space<vmem>>, %arg14: memref<1x4xf32, #tpu.memory_space<vmem>>, %arg15: memref<1x4xf32, #tpu.memory_space<vmem>>, %arg16: memref<1x4xf32, #tpu.memory_space<vmem>>, %arg17: memref<4x16xbf16, #tpu.memory_space<vmem>>, %arg18: memref<1x16xf32, #tpu.memory_space<vmem>>, %arg19: memref<16x4xbf16, #tpu.memory_space<vmem>>, %arg20: memref<1x4xf32, #tpu.memory_space<vmem>>, %arg21: memref<1x4xf32, #tpu.memory_space<vmem>>, %arg22: memref<1x16x4xf32, #tpu.memory_space<vmem>>, %arg23: memref<24x4xf32, #tpu.memory_space<vmem>>) attributes {dimension_semantics = [#tpu.dimension_semantics<parallel>, #tpu.dimension_semantics<parallel>], iteration_bounds = array<i64: 2, 1>, scalar_prefetch = 0 : i64, scratch_operands = 1 : i64, tpu.core_type = #tpu.core_type<tc>, window_params = [{transform_indices = @transform_0, window_bounds = array<i64: 1, 16, 4>}, {transform_indices = @transform_1, window_bounds = array<i64: 1, 8, 4>}, {pipeline_mode = #tpu.pipeline_mode<synchronous>, transform_indices = @transform_2, window_bounds = array<i64: 7, 4>}, {pipeline_mode = #tpu.pipeline_mode<synchronous>, transform_indices = @transform_3, window_bounds = array<i64: 1, 4>}, {pipeline_mode = #tpu.pipeline_mode<synchronous>, transform_indices = @transform_4, window_bounds = array<i64: 1, 4>}, {pipeline_mode = #tpu.pipeline_mode<synchronous>, transform_indices = @transform_5, window_bounds = array<i64: 1, 4>}, {pipeline_mode = #tpu.pipeline_mode<synchronous>, transform_indices = @transform_6, window_bounds = array<i64: 4, 16>}, {pipeline_mode = #tpu.pipeline_mode<synchronous>, transform_indices = @transform_7, window_bounds = array<i64: 1, 16>}, {pipeline_mode = #tpu.pipeline_mode<synchronous>, transform_indices = @transform_8, window_bounds = array<i64: 16, 4>}, {pipeline_mode = #tpu.pipeline_mode<synchronous>, transform_indices = @transform_9, window_bounds = array<i64: 1, 4>}, {pipeline_mode = #tpu.pipeline_mode<synchronous>, transform_indices = @transform_10, window_bounds = array<i64: 1, 4>}, {pipeline_mode = #tpu.pipeline_mode<synchronous>, transform_indices = @transform_11, window_bounds = array<i64: 3, 4>}, {pipeline_mode = #tpu.pipeline_mode<synchronous>, transform_indices = @transform_12, window_bounds = array<i64: 1, 4>}, {pipeline_mode = #tpu.pipeline_mode<synchronous>, transform_indices = @transform_13, window_bounds = array<i64: 1, 4>}, {pipeline_mode = #tpu.pipeline_mode<synchronous>, transform_indices = @transform_14, window_bounds = array<i64: 1, 4>}, {pipeline_mode = #tpu.pipeline_mode<synchronous>, transform_indices = @transform_15, window_bounds = array<i64: 4, 16>}, {pipeline_mode = #tpu.pipeline_mode<synchronous>, transform_indices = @transform_16, window_bounds = array<i64: 1, 16>}, {pipeline_mode = #tpu.pipeline_mode<synchronous>, transform_indices = @transform_17, window_bounds = array<i64: 16, 4>}, {pipeline_mode = #tpu.pipeline_mode<synchronous>, transform_indices = @transform_18, window_bounds = array<i64: 1, 4>}, {pipeline_mode = #tpu.pipeline_mode<synchronous>, transform_indices = @transform_19, window_bounds = array<i64: 1, 4>}, {transform_indices = @transform_20, window_bounds = array<i64: 1, 16, 4>}]} {
    %c0 = arith.constant 0 : index
    %c0_0 = arith.constant 0 : index
    %c0_1 = arith.constant 0 : index
    %0 = vector.load %arg2[%c0, %c0_0, %c0_1] : memref<1x16x4xf32, #tpu.memory_space<vmem>>, vector<1x16x4xf32>
    %1 = vector.shape_cast %0 : vector<1x16x4xf32> to vector<16x4xf32>
    %c0_2 = arith.constant 0 : index
    %c0_3 = arith.constant 0 : index
    %2 = vector.load %arg23[%c0_2, %c0_3] : memref<24x4xf32, #tpu.memory_space<vmem>>, vector<16x4xf32>
    tpu.vector_store %arg23[%c0_2, %c0_3], %1 {strides = array<i32>} : memref<24x4xf32, #tpu.memory_space<vmem>>, vector<16x4xf32>,
    %c0_4 = arith.constant 0 : index
    %c0_5 = arith.constant 0 : index
    %c0_6 = arith.constant 0 : index
    %3 = vector.load %arg3[%c0_4, %c0_5, %c0_6] : memref<1x8x4xf32, #tpu.memory_space<vmem>>, vector<1x6x4xf32>
    %4 = vector.shape_cast %3 : vector<1x6x4xf32> to vector<6x4xf32>
    %c16 = arith.constant 16 : index
    %c0_7 = arith.constant 0 : index
    %5 = vector.load %arg23[%c16, %c0_7] : memref<24x4xf32, #tpu.memory_space<vmem>>, vector<6x4xf32>
    tpu.vector_store %arg23[%c16, %c0_7], %4 {strides = array<i32>} : memref<24x4xf32, #tpu.memory_space<vmem>>, vector<6x4xf32>,
    %c3 = arith.constant 3 : index
    %c0_8 = arith.constant 0 : index
    %6 = vector.load %arg23[%c3, %c0_8] : memref<24x4xf32, #tpu.memory_space<vmem>>, vector<16x4xf32>
    %c0_9 = arith.constant 0 : index
    %c0_10 = arith.constant 0 : index
    %7 = vector.load %arg5[%c0_9, %c0_10] : memref<1x4xf32, #tpu.memory_space<vmem>>, vector<1x4xf32>
    %8 = vector.shape_cast %7 : vector<1x4xf32> to vector<1x4xf32>
    %9 = vector.broadcast %8 : vector<1x4xf32> to vector<16x4xf32>
    %c0_11 = arith.constant 0 : index
    %c0_12 = arith.constant 0 : index
    %10 = vector.load %arg23[%c0_11, %c0_12] : memref<24x4xf32, #tpu.memory_space<vmem>>, vector<16x4xf32>
    %c0_13 = arith.constant 0 : index
    %c0_14 = arith.constant 0 : index
    %11 = vector.load %arg4[%c0_13, %c0_14] : memref<7x4xf32, #tpu.memory_space<vmem>>, vector<1x4xf32>
    %12 = vector.broadcast %11 : vector<1x4xf32> to vector<16x4xf32>
    %13 = arith.mulf %10, %12 : vector<16x4xf32>
    %14 = arith.addf %9, %13 : vector<16x4xf32>
    %c1 = arith.constant 1 : index
    %c0_15 = arith.constant 0 : index
    %15 = vector.load %arg23[%c1, %c0_15] : memref<24x4xf32, #tpu.memory_space<vmem>>, vector<16x4xf32>
    %c1_16 = arith.constant 1 : index
    %c0_17 = arith.constant 0 : index
    %16 = vector.load %arg4[%c1_16, %c0_17] : memref<7x4xf32, #tpu.memory_space<vmem>>, vector<1x4xf32>
    %17 = vector.broadcast %16 : vector<1x4xf32> to vector<16x4xf32>
    %18 = arith.mulf %15, %17 : vector<16x4xf32>
    %19 = arith.addf %14, %18 : vector<16x4xf32>
    %c2 = arith.constant 2 : index
    %c0_18 = arith.constant 0 : index
    %20 = vector.load %arg23[%c2, %c0_18] : memref<24x4xf32, #tpu.memory_space<vmem>>, vector<16x4xf32>
    %c2_19 = arith.constant 2 : index
    %c0_20 = arith.constant 0 : index
    %21 = vector.load %arg4[%c2_19, %c0_20] : memref<7x4xf32, #tpu.memory_space<vmem>>, vector<1x4xf32>
    %22 = vector.broadcast %21 : vector<1x4xf32> to vector<16x4xf32>
    %23 = arith.mulf %20, %22 : vector<16x4xf32>
    %24 = arith.addf %19, %23 : vector<16x4xf32>
    %c3_21 = arith.constant 3 : index
    %c0_22 = arith.constant 0 : index
    %25 = vector.load %arg23[%c3_21, %c0_22] : memref<24x4xf32, #tpu.memory_space<vmem>>, vector<16x4xf32>
    %c3_23 = arith.constant 3 : index
    %c0_24 = arith.constant 0 : index
    %26 = vector.load %arg4[%c3_23, %c0_24] : memref<7x4xf32, #tpu.memory_space<vmem>>, vector<1x4xf32>
    %27 = vector.broadcast %26 : vector<1x4xf32> to vector<16x4xf32>
    %28 = arith.mulf %25, %27 : vector<16x4xf32>
    %29 = arith.addf %24, %28 : vector<16x4xf32>
    %c4 = arith.constant 4 : index
    %c0_25 = arith.constant 0 : index
    %30 = vector.load %arg23[%c4, %c0_25] : memref<24x4xf32, #tpu.memory_space<vmem>>, vector<16x4xf32>
    %c4_26 = arith.constant 4 : index
    %c0_27 = arith.constant 0 : index
    %31 = vector.load %arg4[%c4_26, %c0_27] : memref<7x4xf32, #tpu.memory_space<vmem>>, vector<1x4xf32>
    %32 = vector.broadcast %31 : vector<1x4xf32> to vector<16x4xf32>
    %33 = arith.mulf %30, %32 : vector<16x4xf32>
    %34 = arith.addf %29, %33 : vector<16x4xf32>
    %c5 = arith.constant 5 : index
    %c0_28 = arith.constant 0 : index
    %35 = vector.load %arg23[%c5, %c0_28] : memref<24x4xf32, #tpu.memory_space<vmem>>, vector<16x4xf32>
    %c5_29 = arith.constant 5 : index
    %c0_30 = arith.constant 0 : index
    %36 = vector.load %arg4[%c5_29, %c0_30] : memref<7x4xf32, #tpu.memory_space<vmem>>, vector<1x4xf32>
    %37 = vector.broadcast %36 : vector<1x4xf32> to vector<16x4xf32>
    %38 = arith.mulf %35, %37 : vector<16x4xf32>
    %39 = arith.addf %34, %38 : vector<16x4xf32>
    %c6 = arith.constant 6 : index
    %c0_31 = arith.constant 0 : index
    %40 = vector.load %arg23[%c6, %c0_31] : memref<24x4xf32, #tpu.memory_space<vmem>>, vector<16x4xf32>
    %c6_32 = arith.constant 6 : index
    %c0_33 = arith.constant 0 : index
    %41 = vector.load %arg4[%c6_32, %c0_33] : memref<7x4xf32, #tpu.memory_space<vmem>>, vector<1x4xf32>
    %42 = vector.broadcast %41 : vector<1x4xf32> to vector<16x4xf32>
    %43 = arith.mulf %40, %42 : vector<16x4xf32>
    %44 = arith.addf %39, %43 : vector<16x4xf32>
    %cst = arith.constant dense<0.000000e+00> : vector<16xf32>
    %45 = vector.multi_reduction <add>, %44, %cst [1] : vector<16x4xf32> to vector<16xf32>
    %46 = vector.shape_cast %45 : vector<16xf32> to vector<16x1xf32>
    %cst_34 = arith.constant 4.000000e+00 : f32
    %47 = vector.broadcast %cst_34 : f32 to vector<16x1xf32>
    %48 = arith.divf %46, %47 : vector<16x1xf32>
    %49 = vector.broadcast %48 : vector<16x1xf32> to vector<16x4xf32>
    %50 = arith.subf %44, %49 : vector<16x4xf32>
    %51 = arith.mulf %50, %50 : vector<16x4xf32>
    %cst_35 = arith.constant dense<0.000000e+00> : vector<16xf32>
    %52 = vector.multi_reduction <add>, %51, %cst_35 [1] : vector<16x4xf32> to vector<16xf32>
    %53 = vector.shape_cast %52 : vector<16xf32> to vector<16x1xf32>
    %cst_36 = arith.constant 4.000000e+00 : f32
    %54 = vector.broadcast %cst_36 : f32 to vector<16x1xf32>
    %55 = arith.divf %53, %54 : vector<16x1xf32>
    %cst_37 = arith.constant 9.99999997E-7 : f32
    %56 = vector.broadcast %cst_37 : f32 to vector<16x1xf32>
    %57 = arith.addf %55, %56 : vector<16x1xf32>
    %58 = math.rsqrt %57 : vector<16x1xf32>
    %59 = vector.broadcast %58 : vector<16x1xf32> to vector<16x4xf32>
    %60 = arith.mulf %50, %59 : vector<16x4xf32>
    %c0_38 = arith.constant 0 : index
    %c0_39 = arith.constant 0 : index
    %61 = vector.load %arg6[%c0_38, %c0_39] : memref<1x4xf32, #tpu.memory_space<vmem>>, vector<1x4xf32>
    %62 = vector.broadcast %61 : vector<1x4xf32> to vector<16x4xf32>
    %63 = arith.mulf %60, %62 : vector<16x4xf32>
    %c0_40 = arith.constant 0 : index
    %c0_41 = arith.constant 0 : index
    %64 = vector.load %arg7[%c0_40, %c0_41] : memref<1x4xf32, #tpu.memory_space<vmem>>, vector<1x4xf32>
    %65 = vector.broadcast %64 : vector<1x4xf32> to vector<16x4xf32>
    %66 = arith.addf %63, %65 : vector<16x4xf32>
    %67 = arith.truncf %66 : vector<16x4xf32> to vector<16x4xbf16>
    %c0_42 = arith.constant 0 : index
    %c0_43 = arith.constant 0 : index
    %68 = vector.load %arg8[%c0_42, %c0_43] : memref<4x16xbf16, #tpu.memory_space<vmem>>, vector<4x16xbf16>
    %cst_44 = arith.constant dense<0.000000e+00> : vector<16x16xf32>
    %69 = tpu.matmul %67, %68, %cst_44 {dimension_numbers = #tpu.dot_dimension_numbers<[1], [0], [0], [1], [0, 0, 1, 1], [], []>} : vector<16x4xbf16>, vector<4x16xbf16>, vector<16x16xf32> -> vector<16x16xf32>
    %c0_45 = arith.constant 0 : index
    %c0_46 = arith.constant 0 : index
    %70 = vector.load %arg9[%c0_45, %c0_46] : memref<1x16xf32, #tpu.memory_space<vmem>>, vector<1x16xf32>
    %71 = vector.broadcast %70 : vector<1x16xf32> to vector<16x16xf32>
    %72 = arith.addf %69, %71 : vector<16x16xf32>
    %cst_47 = arith.constant 5.000000e-01 : f32
    %73 = vector.broadcast %cst_47 : f32 to vector<16x16xf32>
    %74 = arith.mulf %73, %72 : vector<16x16xf32>
    %cst_48 = arith.constant 4.471500e-02 : f32
    %75 = vector.broadcast %cst_48 : f32 to vector<16x16xf32>
    %76 = arith.mulf %75, %72 : vector<16x16xf32>
    %77 = arith.mulf %76, %72 : vector<16x16xf32>
    %78 = arith.mulf %77, %72 : vector<16x16xf32>
    %79 = arith.addf %72, %78 : vector<16x16xf32>
    %cst_49 = arith.constant 0.797884583 : f32
    %80 = vector.broadcast %cst_49 : f32 to vector<16x16xf32>
    %81 = arith.mulf %80, %79 : vector<16x16xf32>
    %82 = math.tanh %81 : vector<16x16xf32>
    %cst_50 = arith.constant 1.000000e+00 : f32
    %83 = vector.broadcast %cst_50 : f32 to vector<16x16xf32>
    %84 = arith.addf %83, %82 : vector<16x16xf32>
    %85 = arith.mulf %74, %84 : vector<16x16xf32>
    %86 = arith.truncf %85 : vector<16x16xf32> to vector<16x16xbf16>
    %c0_51 = arith.constant 0 : index
    %c0_52 = arith.constant 0 : index
    %87 = vector.load %arg10[%c0_51, %c0_52] : memref<16x4xbf16, #tpu.memory_space<vmem>>, vector<16x4xbf16>
    %cst_53 = arith.constant dense<0.000000e+00> : vector<16x4xf32>
    %88 = tpu.matmul %86, %87, %cst_53 {dimension_numbers = #tpu.dot_dimension_numbers<[1], [0], [0], [1], [0, 0, 1, 1], [], []>} : vector<16x16xbf16>, vector<16x4xbf16>, vector<16x4xf32> -> vector<16x4xf32>
    %c0_54 = arith.constant 0 : index
    %c0_55 = arith.constant 0 : index
    %89 = vector.load %arg11[%c0_54, %c0_55] : memref<1x4xf32, #tpu.memory_space<vmem>>, vector<1x4xf32>
    %90 = vector.broadcast %89 : vector<1x4xf32> to vector<16x4xf32>
    %91 = arith.addf %88, %90 : vector<16x4xf32>
    %c0_56 = arith.constant 0 : index
    %c0_57 = arith.constant 0 : index
    %92 = vector.load %arg12[%c0_56, %c0_57] : memref<1x4xf32, #tpu.memory_space<vmem>>, vector<1x4xf32>
    %93 = vector.broadcast %92 : vector<1x4xf32> to vector<16x4xf32>
    %94 = arith.mulf %91, %93 : vector<16x4xf32>
    %95 = arith.addf %6, %94 : vector<16x4xf32>
    %c0_58 = arith.constant 0 : index
    %c0_59 = arith.constant 0 : index
    %96 = vector.load %arg14[%c0_58, %c0_59] : memref<1x4xf32, #tpu.memory_space<vmem>>, vector<1x4xf32>
    %97 = vector.shape_cast %96 : vector<1x4xf32> to vector<1x4xf32>
    %98 = vector.broadcast %97 : vector<1x4xf32> to vector<16x4xf32>
    %c2_60 = arith.constant 2 : index
    %c0_61 = arith.constant 0 : index
    %99 = vector.load %arg23[%c2_60, %c0_61] : memref<24x4xf32, #tpu.memory_space<vmem>>, vector<16x4xf32>
    %c0_62 = arith.constant 0 : index
    %c0_63 = arith.constant 0 : index
    %100 = vector.load %arg13[%c0_62, %c0_63] : memref<3x4xf32, #tpu.memory_space<vmem>>, vector<1x4xf32>
    %101 = vector.broadcast %100 : vector<1x4xf32> to vector<16x4xf32>
    %102 = arith.mulf %99, %101 : vector<16x4xf32>
    %103 = arith.addf %98, %102 : vector<16x4xf32>
    %c3_64 = arith.constant 3 : index
    %c0_65 = arith.constant 0 : index
    %104 = vector.load %arg23[%c3_64, %c0_65] : memref<24x4xf32, #tpu.memory_space<vmem>>, vector<16x4xf32>
    %c1_66 = arith.constant 1 : index
    %c0_67 = arith.constant 0 : index
    %105 = vector.load %arg13[%c1_66, %c0_67] : memref<3x4xf32, #tpu.memory_space<vmem>>, vector<1x4xf32>
    %106 = vector.broadcast %105 : vector<1x4xf32> to vector<16x4xf32>
    %107 = arith.mulf %104, %106 : vector<16x4xf32>
    %108 = arith.addf %103, %107 : vector<16x4xf32>
    %c4_68 = arith.constant 4 : index
    %c0_69 = arith.constant 0 : index
    %109 = vector.load %arg23[%c4_68, %c0_69] : memref<24x4xf32, #tpu.memory_space<vmem>>, vector<16x4xf32>
    %c2_70 = arith.constant 2 : index
    %c0_71 = arith.constant 0 : index
    %110 = vector.load %arg13[%c2_70, %c0_71] : memref<3x4xf32, #tpu.memory_space<vmem>>, vector<1x4xf32>
    %111 = vector.broadcast %110 : vector<1x4xf32> to vector<16x4xf32>
    %112 = arith.mulf %109, %111 : vector<16x4xf32>
    %113 = arith.addf %108, %112 : vector<16x4xf32>
    %cst_72 = arith.constant dense<0.000000e+00> : vector<16xf32>
    %114 = vector.multi_reduction <add>, %113, %cst_72 [1] : vector<16x4xf32> to vector<16xf32>
    %115 = vector.shape_cast %114 : vector<16xf32> to vector<16x1xf32>
    %cst_73 = arith.constant 4.000000e+00 : f32
    %116 = vector.broadcast %cst_73 : f32 to vector<16x1xf32>
    %117 = arith.divf %115, %116 : vector<16x1xf32>
    %118 = vector.broadcast %117 : vector<16x1xf32> to vector<16x4xf32>
    %119 = arith.subf %113, %118 : vector<16x4xf32>
    %120 = arith.mulf %119, %119 : vector<16x4xf32>
    %cst_74 = arith.constant dense<0.000000e+00> : vector<16xf32>
    %121 = vector.multi_reduction <add>, %120, %cst_74 [1] : vector<16x4xf32> to vector<16xf32>
    %122 = vector.shape_cast %121 : vector<16xf32> to vector<16x1xf32>
    %cst_75 = arith.constant 4.000000e+00 : f32
    %123 = vector.broadcast %cst_75 : f32 to vector<16x1xf32>
    %124 = arith.divf %122, %123 : vector<16x1xf32>
    %cst_76 = arith.constant 9.99999997E-7 : f32
    %125 = vector.broadcast %cst_76 : f32 to vector<16x1xf32>
    %126 = arith.addf %124, %125 : vector<16x1xf32>
    %127 = math.rsqrt %126 : vector<16x1xf32>
    %128 = vector.broadcast %127 : vector<16x1xf32> to vector<16x4xf32>
    %129 = arith.mulf %119, %128 : vector<16x4xf32>
    %c0_77 = arith.constant 0 : index
    %c0_78 = arith.constant 0 : index
    %130 = vector.load %arg15[%c0_77, %c0_78] : memref<1x4xf32, #tpu.memory_space<vmem>>, vector<1x4xf32>
    %131 = vector.broadcast %130 : vector<1x4xf32> to vector<16x4xf32>
    %132 = arith.mulf %129, %131 : vector<16x4xf32>
    %c0_79 = arith.constant 0 : index
    %c0_80 = arith.constant 0 : index
    %133 = vector.load %arg16[%c0_79, %c0_80] : memref<1x4xf32, #tpu.memory_space<vmem>>, vector<1x4xf32>
    %134 = vector.broadcast %133 : vector<1x4xf32> to vector<16x4xf32>
    %135 = arith.addf %132, %134 : vector<16x4xf32>
    %136 = arith.truncf %135 : vector<16x4xf32> to vector<16x4xbf16>
    %c0_81 = arith.constant 0 : index
    %c0_82 = arith.constant 0 : index
    %137 = vector.load %arg17[%c0_81, %c0_82] : memref<4x16xbf16, #tpu.memory_space<vmem>>, vector<4x16xbf16>
    %cst_83 = arith.constant dense<0.000000e+00> : vector<16x16xf32>
    %138 = tpu.matmul %136, %137, %cst_83 {dimension_numbers = #tpu.dot_dimension_numbers<[1], [0], [0], [1], [0, 0, 1, 1], [], []>} : vector<16x4xbf16>, vector<4x16xbf16>, vector<16x16xf32> -> vector<16x16xf32>
    %c0_84 = arith.constant 0 : index
    %c0_85 = arith.constant 0 : index
    %139 = vector.load %arg18[%c0_84, %c0_85] : memref<1x16xf32, #tpu.memory_space<vmem>>, vector<1x16xf32>
    %140 = vector.broadcast %139 : vector<1x16xf32> to vector<16x16xf32>
    %141 = arith.addf %138, %140 : vector<16x16xf32>
    %cst_86 = arith.constant 5.000000e-01 : f32
    %142 = vector.broadcast %cst_86 : f32 to vector<16x16xf32>
    %143 = arith.mulf %142, %141 : vector<16x16xf32>
    %cst_87 = arith.constant 4.471500e-02 : f32
    %144 = vector.broadcast %cst_87 : f32 to vector<16x16xf32>
    %145 = arith.mulf %144, %141 : vector<16x16xf32>
    %146 = arith.mulf %145, %141 : vector<16x16xf32>
    %147 = arith.mulf %146, %141 : vector<16x16xf32>
    %148 = arith.addf %141, %147 : vector<16x16xf32>
    %cst_88 = arith.constant 0.797884583 : f32
    %149 = vector.broadcast %cst_88 : f32 to vector<16x16xf32>
    %150 = arith.mulf %149, %148 : vector<16x16xf32>
    %151 = math.tanh %150 : vector<16x16xf32>
    %cst_89 = arith.constant 1.000000e+00 : f32
    %152 = vector.broadcast %cst_89 : f32 to vector<16x16xf32>
    %153 = arith.addf %152, %151 : vector<16x16xf32>
    %154 = arith.mulf %143, %153 : vector<16x16xf32>
    %155 = arith.truncf %154 : vector<16x16xf32> to vector<16x16xbf16>
    %c0_90 = arith.constant 0 : index
    %c0_91 = arith.constant 0 : index
    %156 = vector.load %arg19[%c0_90, %c0_91] : memref<16x4xbf16, #tpu.memory_space<vmem>>, vector<16x4xbf16>
    %cst_92 = arith.constant dense<0.000000e+00> : vector<16x4xf32>
    %157 = tpu.matmul %155, %156, %cst_92 {dimension_numbers = #tpu.dot_dimension_numbers<[1], [0], [0], [1], [0, 0, 1, 1], [], []>} : vector<16x16xbf16>, vector<16x4xbf16>, vector<16x4xf32> -> vector<16x4xf32>
    %c0_93 = arith.constant 0 : index
    %c0_94 = arith.constant 0 : index
    %158 = vector.load %arg20[%c0_93, %c0_94] : memref<1x4xf32, #tpu.memory_space<vmem>>, vector<1x4xf32>
    %159 = vector.broadcast %158 : vector<1x4xf32> to vector<16x4xf32>
    %160 = arith.addf %157, %159 : vector<16x4xf32>
    %c0_95 = arith.constant 0 : index
    %c0_96 = arith.constant 0 : index
    %161 = vector.load %arg21[%c0_95, %c0_96] : memref<1x4xf32, #tpu.memory_space<vmem>>, vector<1x4xf32>
    %162 = vector.broadcast %161 : vector<1x4xf32> to vector<16x4xf32>
    %163 = arith.mulf %160, %162 : vector<16x4xf32>
    %164 = arith.addf %95, %163 : vector<16x4xf32>
    %c0_97 = arith.constant 0 : index
    %c0_98 = arith.constant 0 : index
    %c0_99 = arith.constant 0 : index
    %165 = vector.load %arg22[%c0_97, %c0_98, %c0_99] : memref<1x16x4xf32, #tpu.memory_space<vmem>>, vector<1x16x4xf32>
    %166 = vector.shape_cast %165 : vector<1x16x4xf32> to vector<16x4xf32>
    %167 = vector.shape_cast %164 : vector<16x4xf32> to vector<1x16x4xf32>
    tpu.vector_store %arg22[%c0_97, %c0_98, %c0_99], %167 {strides = array<i32>} : memref<1x16x4xf32, #tpu.memory_space<vmem>>, vector<1x16x4xf32>,
    return
  }
  func.func @transform_0(%arg0: i32, %arg1: i32) -> (i32, i32, i32) {
    %c0_i32 = arith.constant 0 : i32
    %c0_i32_0 = arith.constant 0 : i32
    return %arg0, %arg1, %c0_i32 : i32, i32, i32
  }
  func.func @transform_1(%arg0: i32, %arg1: i32) -> (i32, i32, i32) {
    %c1_i32 = arith.constant 1 : i32
    %0 = arith.addi %arg1, %c1_i32 : i32
    %c2_i32 = arith.constant 2 : i32
    %1 = arith.muli %0, %c2_i32 : i32
    %c0_i32 = arith.constant 0 : i32
    %c0_i32_0 = arith.constant 0 : i32
    return %arg0, %1, %c0_i32 : i32, i32, i32
  }
  func.func @transform_2(%arg0: i32, %arg1: i32) -> (i32, i32) {
    %c0_i32 = arith.constant 0 : i32
    %c0_i32_0 = arith.constant 0 : i32
    %c0_i32_1 = arith.constant 0 : i32
    return %c0_i32, %c0_i32_0 : i32, i32
  }
  func.func @transform_3(%arg0: i32, %arg1: i32) -> (i32, i32) {
    %c0_i32 = arith.constant 0 : i32
    %c0_i32_0 = arith.constant 0 : i32
    %c0_i32_1 = arith.constant 0 : i32
    return %c0_i32, %c0_i32_0 : i32, i32
  }
  func.func @transform_4(%arg0: i32, %arg1: i32) -> (i32, i32) {
    %c0_i32 = arith.constant 0 : i32
    %c0_i32_0 = arith.constant 0 : i32
    %c0_i32_1 = arith.constant 0 : i32
    return %c0_i32, %c0_i32_0 : i32, i32
  }
  func.func @transform_5(%arg0: i32, %arg1: i32) -> (i32, i32) {
    %c0_i32 = arith.constant 0 : i32
    %c0_i32_0 = arith.constant 0 : i32
    %c0_i32_1 = arith.constant 0 : i32
    return %c0_i32, %c0_i32_0 : i32, i32
  }
  func.func @transform_6(%arg0: i32, %arg1: i32) -> (i32, i32) {
    %c0_i32 = arith.constant 0 : i32
    %c0_i32_0 = arith.constant 0 : i32
    %c0_i32_1 = arith.constant 0 : i32
    return %c0_i32, %c0_i32_0 : i32, i32
  }
  func.func @transform_7(%arg0: i32, %arg1: i32) -> (i32, i32) {
    %c0_i32 = arith.constant 0 : i32
    %c0_i32_0 = arith.constant 0 : i32
    %c0_i32_1 = arith.constant 0 : i32
    return %c0_i32, %c0_i32_0 : i32, i32
  }
  func.func @transform_8(%arg0: i32, %arg1: i32) -> (i32, i32) {
    %c0_i32 = arith.constant 0 : i32
    %c0_i32_0 = arith.constant 0 : i32
    %c0_i32_1 = arith.constant 0 : i32
    return %c0_i32, %c0_i32_0 : i32, i32
  }
  func.func @transform_9(%arg0: i32, %arg1: i32) -> (i32, i32) {
    %c0_i32 = arith.constant 0 : i32
    %c0_i32_0 = arith.constant 0 : i32
    %c0_i32_1 = arith.constant 0 : i32
    return %c0_i32, %c0_i32_0 : i32, i32
  }
  func.func @transform_10(%arg0: i32, %arg1: i32) -> (i32, i32) {
    %c0_i32 = arith.constant 0 : i32
    %c0_i32_0 = arith.constant 0 : i32
    %c0_i32_1 = arith.constant 0 : i32
    return %c0_i32, %c0_i32_0 : i32, i32
  }
  func.func @transform_11(%arg0: i32, %arg1: i32) -> (i32, i32) {
    %c0_i32 = arith.constant 0 : i32
    %c0_i32_0 = arith.constant 0 : i32
    %c0_i32_1 = arith.constant 0 : i32
    return %c0_i32, %c0_i32_0 : i32, i32
  }
  func.func @transform_12(%arg0: i32, %arg1: i32) -> (i32, i32) {
    %c0_i32 = arith.constant 0 : i32
    %c0_i32_0 = arith.constant 0 : i32
    %c0_i32_1 = arith.constant 0 : i32
    return %c0_i32, %c0_i32_0 : i32, i32
  }
  func.func @transform_13(%arg0: i32, %arg1: i32) -> (i32, i32) {
    %c0_i32 = arith.constant 0 : i32
    %c0_i32_0 = arith.constant 0 : i32
    %c0_i32_1 = arith.constant 0 : i32
    return %c0_i32, %c0_i32_0 : i32, i32
  }
  func.func @transform_14(%arg0: i32, %arg1: i32) -> (i32, i32) {
    %c0_i32 = arith.constant 0 : i32
    %c0_i32_0 = arith.constant 0 : i32
    %c0_i32_1 = arith.constant 0 : i32
    return %c0_i32, %c0_i32_0 : i32, i32
  }
  func.func @transform_15(%arg0: i32, %arg1: i32) -> (i32, i32) {
    %c0_i32 = arith.constant 0 : i32
    %c0_i32_0 = arith.constant 0 : i32
    %c0_i32_1 = arith.constant 0 : i32
    return %c0_i32, %c0_i32_0 : i32, i32
  }
  func.func @transform_16(%arg0: i32, %arg1: i32) -> (i32, i32) {
    %c0_i32 = arith.constant 0 : i32
    %c0_i32_0 = arith.constant 0 : i32
    %c0_i32_1 = arith.constant 0 : i32
    return %c0_i32, %c0_i32_0 : i32, i32
  }
  func.func @transform_17(%arg0: i32, %arg1: i32) -> (i32, i32) {
    %c0_i32 = arith.constant 0 : i32
    %c0_i32_0 = arith.constant 0 : i32
    %c0_i32_1 = arith.constant 0 : i32
    return %c0_i32, %c0_i32_0 : i32, i32
  }
  func.func @transform_18(%arg0: i32, %arg1: i32) -> (i32, i32) {
    %c0_i32 = arith.constant 0 : i32
    %c0_i32_0 = arith.constant 0 : i32
    %c0_i32_1 = arith.constant 0 : i32
    return %c0_i32, %c0_i32_0 : i32, i32
  }
  func.func @transform_19(%arg0: i32, %arg1: i32) -> (i32, i32) {
    %c0_i32 = arith.constant 0 : i32
    %c0_i32_0 = arith.constant 0 : i32
    %c0_i32_1 = arith.constant 0 : i32
    return %c0_i32, %c0_i32_0 : i32, i32
  }
  func.func @transform_20(%arg0: i32, %arg1: i32) -> (i32, i32, i32) {
    %c0_i32 = arith.constant 0 : i32
    %c0_i32_0 = arith.constant 0 : i32
    return %arg0, %arg1, %c0_i32 : i32, i32, i32
  }
}

module attributes {stable_mosaic.version = 11 : i64} {
  func.func @_parallel_convnext_kernel(%arg0: i32, %arg1: i32, %arg2: memref<1x16x4xf32, #tpu.memory_space<vmem>>, %arg3: memref<1x8x4xf32, #tpu.memory_space<vmem>>, %arg4: memref<7x4xf32, #tpu.memory_space<vmem>>, %arg5: memref<1x4xf32, #tpu.memory_space<vmem>>, %arg6: memref<1x4xf32, #tpu.memory_space<vmem>>, %arg7: memref<1x4xf32, #tpu.memory_space<vmem>>, %arg8: memref<4x16xbf16, #tpu.memory_space<vmem>>, %arg9: memref<1x16xf32, #tpu.memory_space<vmem>>, %arg10: memref<16x4xbf16, #tpu.memory_space<vmem>>, %arg11: memref<1x4xf32, #tpu.memory_space<vmem>>, %arg12: memref<1x4xf32, #tpu.memory_space<vmem>>, %arg13: memref<3x4xf32, #tpu.memory_space<vmem>>, %arg14: memref<1x4xf32, #tpu.memory_space<vmem>>, %arg15: memref<1x4xf32, #tpu.memory_space<vmem>>, %arg16: memref<1x4xf32, #tpu.memory_space<vmem>>, %arg17: memref<4x16xbf16, #tpu.memory_space<vmem>>, %arg18: memref<1x16xf32, #tpu.memory_space<vmem>>, %arg19: memref<16x4xbf16, #tpu.memory_space<vmem>>, %arg20: memref<1x4xf32, #tpu.memory_space<vmem>>, %arg21: memref<1x4xf32, #tpu.memory_space<vmem>>, %arg22: memref<1x16x4xf32, #tpu.memory_space<vmem>>, %arg23: memref<24x4xf32, #tpu.memory_space<vmem>>) attributes {dimension_semantics = [#tpu.dimension_semantics<parallel>, #tpu.dimension_semantics<parallel>], iteration_bounds = array<i64: 2, 1>, scalar_prefetch = 0 : i64, scratch_operands = 1 : i64, tpu.core_type = #tpu.core_type<tc>, window_params = [{transform_indices = @transform_0, window_bounds = array<i64: 1, 16, 4>}, {transform_indices = @transform_1, window_bounds = array<i64: 1, 8, 4>}, {pipeline_mode = #tpu.pipeline_mode<synchronous>, transform_indices = @transform_2, window_bounds = array<i64: 7, 4>}, {pipeline_mode = #tpu.pipeline_mode<synchronous>, transform_indices = @transform_3, window_bounds = array<i64: 1, 4>}, {pipeline_mode = #tpu.pipeline_mode<synchronous>, transform_indices = @transform_4, window_bounds = array<i64: 1, 4>}, {pipeline_mode = #tpu.pipeline_mode<synchronous>, transform_indices = @transform_5, window_bounds = array<i64: 1, 4>}, {pipeline_mode = #tpu.pipeline_mode<synchronous>, transform_indices = @transform_6, window_bounds = array<i64: 4, 16>}, {pipeline_mode = #tpu.pipeline_mode<synchronous>, transform_indices = @transform_7, window_bounds = array<i64: 1, 16>}, {pipeline_mode = #tpu.pipeline_mode<synchronous>, transform_indices = @transform_8, window_bounds = array<i64: 16, 4>}, {pipeline_mode = #tpu.pipeline_mode<synchronous>, transform_indices = @transform_9, window_bounds = array<i64: 1, 4>}, {pipeline_mode = #tpu.pipeline_mode<synchronous>, transform_indices = @transform_10, window_bounds = array<i64: 1, 4>}, {pipeline_mode = #tpu.pipeline_mode<synchronous>, transform_indices = @transform_11, window_bounds = array<i64: 3, 4>}, {pipeline_mode = #tpu.pipeline_mode<synchronous>, transform_indices = @transform_12, window_bounds = array<i64: 1, 4>}, {pipeline_mode = #tpu.pipeline_mode<synchronous>, transform_indices = @transform_13, window_bounds = array<i64: 1, 4>}, {pipeline_mode = #tpu.pipeline_mode<synchronous>, transform_indices = @transform_14, window_bounds = array<i64: 1, 4>}, {pipeline_mode = #tpu.pipeline_mode<synchronous>, transform_indices = @transform_15, window_bounds = array<i64: 4, 16>}, {pipeline_mode = #tpu.pipeline_mode<synchronous>, transform_indices = @transform_16, window_bounds = array<i64: 1, 16>}, {pipeline_mode = #tpu.pipeline_mode<synchronous>, transform_indices = @transform_17, window_bounds = array<i64: 16, 4>}, {pipeline_mode = #tpu.pipeline_mode<synchronous>, transform_indices = @transform_18, window_bounds = array<i64: 1, 4>}, {pipeline_mode = #tpu.pipeline_mode<synchronous>, transform_indices = @transform_19, window_bounds = array<i64: 1, 4>}, {transform_indices = @transform_20, window_bounds = array<i64: 1, 16, 4>}]} {
    %c0 = arith.constant 0 : index
    %c0_0 = arith.constant 0 : index
    %c0_1 = arith.constant 0 : index
    %0 = vector.load %arg2[%c0, %c0_0, %c0_1] : memref<1x16x4xf32, #tpu.memory_space<vmem>>, vector<1x16x4xf32>
    %1 = vector.shape_cast %0 : vector<1x16x4xf32> to vector<16x4xf32>
    %c0_2 = arith.constant 0 : index
    %c0_3 = arith.constant 0 : index
    %2 = vector.load %arg23[%c0_2, %c0_3] : memref<24x4xf32, #tpu.memory_space<vmem>>, vector<16x4xf32>
    tpu.vector_store %arg23[%c0_2, %c0_3], %1 {strides = array<i32>} : memref<24x4xf32, #tpu.memory_space<vmem>>, vector<16x4xf32>,
    %c0_4 = arith.constant 0 : index
    %c0_5 = arith.constant 0 : index
    %c0_6 = arith.constant 0 : index
    %3 = vector.load %arg3[%c0_4, %c0_5, %c0_6] : memref<1x8x4xf32, #tpu.memory_space<vmem>>, vector<1x6x4xf32>
    %4 = vector.shape_cast %3 : vector<1x6x4xf32> to vector<6x4xf32>
    %c16 = arith.constant 16 : index
    %c0_7 = arith.constant 0 : index
    %5 = vector.load %arg23[%c16, %c0_7] : memref<24x4xf32, #tpu.memory_space<vmem>>, vector<6x4xf32>
    tpu.vector_store %arg23[%c16, %c0_7], %4 {strides = array<i32>} : memref<24x4xf32, #tpu.memory_space<vmem>>, vector<6x4xf32>,
    %c3 = arith.constant 3 : index
    %c0_8 = arith.constant 0 : index
    %6 = vector.load %arg23[%c3, %c0_8] : memref<24x4xf32, #tpu.memory_space<vmem>>, vector<16x4xf32>
    %c0_9 = arith.constant 0 : index
    %c0_10 = arith.constant 0 : index
    %7 = vector.load %arg5[%c0_9, %c0_10] : memref<1x4xf32, #tpu.memory_space<vmem>>, vector<1x4xf32>
    %8 = vector.shape_cast %7 : vector<1x4xf32> to vector<1x4xf32>
    %9 = vector.broadcast %8 : vector<1x4xf32> to vector<16x4xf32>
    %c0_11 = arith.constant 0 : index
    %c0_12 = arith.constant 0 : index
    %10 = vector.load %arg23[%c0_11, %c0_12] : memref<24x4xf32, #tpu.memory_space<vmem>>, vector<16x4xf32>
    %c0_13 = arith.constant 0 : index
    %c0_14 = arith.constant 0 : index
    %11 = vector.load %arg4[%c0_13, %c0_14] : memref<7x4xf32, #tpu.memory_space<vmem>>, vector<1x4xf32>
    %12 = vector.broadcast %11 : vector<1x4xf32> to vector<16x4xf32>
    %13 = arith.mulf %10, %12 : vector<16x4xf32>
    %14 = arith.addf %9, %13 : vector<16x4xf32>
    %c1 = arith.constant 1 : index
    %c0_15 = arith.constant 0 : index
    %15 = vector.load %arg23[%c1, %c0_15] : memref<24x4xf32, #tpu.memory_space<vmem>>, vector<16x4xf32>
    %c1_16 = arith.constant 1 : index
    %c0_17 = arith.constant 0 : index
    %16 = vector.load %arg4[%c1_16, %c0_17] : memref<7x4xf32, #tpu.memory_space<vmem>>, vector<1x4xf32>
    %17 = vector.broadcast %16 : vector<1x4xf32> to vector<16x4xf32>
    %18 = arith.mulf %15, %17 : vector<16x4xf32>
    %19 = arith.addf %14, %18 : vector<16x4xf32>
    %c2 = arith.constant 2 : index
    %c0_18 = arith.constant 0 : index
    %20 = vector.load %arg23[%c2, %c0_18] : memref<24x4xf32, #tpu.memory_space<vmem>>, vector<16x4xf32>
    %c2_19 = arith.constant 2 : index
    %c0_20 = arith.constant 0 : index
    %21 = vector.load %arg4[%c2_19, %c0_20] : memref<7x4xf32, #tpu.memory_space<vmem>>, vector<1x4xf32>
    %22 = vector.broadcast %21 : vector<1x4xf32> to vector<16x4xf32>
    %23 = arith.mulf %20, %22 : vector<16x4xf32>
    %24 = arith.addf %19, %23 : vector<16x4xf32>
    %c3_21 = arith.constant 3 : index
    %c0_22 = arith.constant 0 : index
    %25 = vector.load %arg23[%c3_21, %c0_22] : memref<24x4xf32, #tpu.memory_space<vmem>>, vector<16x4xf32>
    %c3_23 = arith.constant 3 : index
    %c0_24 = arith.constant 0 : index
    %26 = vector.load %arg4[%c3_23, %c0_24] : memref<7x4xf32, #tpu.memory_space<vmem>>, vector<1x4xf32>
    %27 = vector.broadcast %26 : vector<1x4xf32> to vector<16x4xf32>
    %28 = arith.mulf %25, %27 : vector<16x4xf32>
    %29 = arith.addf %24, %28 : vector<16x4xf32>
    %c4 = arith.constant 4 : index
    %c0_25 = arith.constant 0 : index
    %30 = vector.load %arg23[%c4, %c0_25] : memref<24x4xf32, #tpu.memory_space<vmem>>, vector<16x4xf32>
    %c4_26 = arith.constant 4 : index
    %c0_27 = arith.constant 0 : index
    %31 = vector.load %arg4[%c4_26, %c0_27] : memref<7x4xf32, #tpu.memory_space<vmem>>, vector<1x4xf32>
    %32 = vector.broadcast %31 : vector<1x4xf32> to vector<16x4xf32>
    %33 = arith.mulf %30, %32 : vector<16x4xf32>
    %34 = arith.addf %29, %33 : vector<16x4xf32>
    %c5 = arith.constant 5 : index
    %c0_28 = arith.constant 0 : index
    %35 = vector.load %arg23[%c5, %c0_28] : memref<24x4xf32, #tpu.memory_space<vmem>>, vector<16x4xf32>
    %c5_29 = arith.constant 5 : index
    %c0_30 = arith.constant 0 : index
    %36 = vector.load %arg4[%c5_29, %c0_30] : memref<7x4xf32, #tpu.memory_space<vmem>>, vector<1x4xf32>
    %37 = vector.broadcast %36 : vector<1x4xf32> to vector<16x4xf32>
    %38 = arith.mulf %35, %37 : vector<16x4xf32>
    %39 = arith.addf %34, %38 : vector<16x4xf32>
    %c6 = arith.constant 6 : index
    %c0_31 = arith.constant 0 : index
    %40 = vector.load %arg23[%c6, %c0_31] : memref<24x4xf32, #tpu.memory_space<vmem>>, vector<16x4xf32>
    %c6_32 = arith.constant 6 : index
    %c0_33 = arith.constant 0 : index
    %41 = vector.load %arg4[%c6_32, %c0_33] : memref<7x4xf32, #tpu.memory_space<vmem>>, vector<1x4xf32>
    %42 = vector.broadcast %41 : vector<1x4xf32> to vector<16x4xf32>
    %43 = arith.mulf %40, %42 : vector<16x4xf32>
    %44 = arith.addf %39, %43 : vector<16x4xf32>
    %cst = arith.constant dense<0.000000e+00> : vector<16xf32>
    %45 = vector.multi_reduction <add>, %44, %cst [1] : vector<16x4xf32> to vector<16xf32>
    %46 = vector.shape_cast %45 : vector<16xf32> to vector<16x1xf32>
    %cst_34 = arith.constant 4.000000e+00 : f32
    %47 = vector.broadcast %cst_34 : f32 to vector<16x1xf32>
    %48 = arith.divf %46, %47 : vector<16x1xf32>
    %49 = vector.broadcast %48 : vector<16x1xf32> to vector<16x4xf32>
    %50 = arith.subf %44, %49 : vector<16x4xf32>
    %51 = arith.mulf %50, %50 : vector<16x4xf32>
    %cst_35 = arith.constant dense<0.000000e+00> : vector<16xf32>
    %52 = vector.multi_reduction <add>, %51, %cst_35 [1] : vector<16x4xf32> to vector<16xf32>
    %53 = vector.shape_cast %52 : vector<16xf32> to vector<16x1xf32>
    %cst_36 = arith.constant 4.000000e+00 : f32
    %54 = vector.broadcast %cst_36 : f32 to vector<16x1xf32>
    %55 = arith.divf %53, %54 : vector<16x1xf32>
    %cst_37 = arith.constant 9.99999997E-7 : f32
    %56 = vector.broadcast %cst_37 : f32 to vector<16x1xf32>
    %57 = arith.addf %55, %56 : vector<16x1xf32>
    %58 = math.rsqrt %57 : vector<16x1xf32>
    %59 = vector.broadcast %58 : vector<16x1xf32> to vector<16x4xf32>
    %60 = arith.mulf %50, %59 : vector<16x4xf32>
    %c0_38 = arith.constant 0 : index
    %c0_39 = arith.constant 0 : index
    %61 = vector.load %arg6[%c0_38, %c0_39] : memref<1x4xf32, #tpu.memory_space<vmem>>, vector<1x4xf32>
    %62 = vector.broadcast %61 : vector<1x4xf32> to vector<16x4xf32>
    %63 = arith.mulf %60, %62 : vector<16x4xf32>
    %c0_40 = arith.constant 0 : index
    %c0_41 = arith.constant 0 : index
    %64 = vector.load %arg7[%c0_40, %c0_41] : memref<1x4xf32, #tpu.memory_space<vmem>>, vector<1x4xf32>
    %65 = vector.broadcast %64 : vector<1x4xf32> to vector<16x4xf32>
    %66 = arith.addf %63, %65 : vector<16x4xf32>
    %67 = arith.truncf %66 : vector<16x4xf32> to vector<16x4xbf16>
    %c0_42 = arith.constant 0 : index
    %c0_43 = arith.constant 0 : index
    %68 = vector.load %arg8[%c0_42, %c0_43] : memref<4x16xbf16, #tpu.memory_space<vmem>>, vector<4x16xbf16>
    %cst_44 = arith.constant dense<0.000000e+00> : vector<16x16xf32>
    %69 = tpu.matmul %67, %68, %cst_44 {dimension_numbers = #tpu.dot_dimension_numbers<[1], [0], [0], [1], [0, 0, 1, 1], [], []>} : vector<16x4xbf16>, vector<4x16xbf16>, vector<16x16xf32> -> vector<16x16xf32>
    %c0_45 = arith.constant 0 : index
    %c0_46 = arith.constant 0 : index
    %70 = vector.load %arg9[%c0_45, %c0_46] : memref<1x16xf32, #tpu.memory_space<vmem>>, vector<1x16xf32>
    %71 = vector.broadcast %70 : vector<1x16xf32> to vector<16x16xf32>
    %72 = arith.addf %69, %71 : vector<16x16xf32>
    %cst_47 = arith.constant 5.000000e-01 : f32
    %73 = vector.broadcast %cst_47 : f32 to vector<16x16xf32>
    %74 = arith.mulf %73, %72 : vector<16x16xf32>
    %cst_48 = arith.constant 4.471500e-02 : f32
    %75 = vector.broadcast %cst_48 : f32 to vector<16x16xf32>
    %76 = arith.mulf %75, %72 : vector<16x16xf32>
    %77 = arith.mulf %76, %72 : vector<16x16xf32>
    %78 = arith.mulf %77, %72 : vector<16x16xf32>
    %79 = arith.addf %72, %78 : vector<16x16xf32>
    %cst_49 = arith.constant 0.797884583 : f32
    %80 = vector.broadcast %cst_49 : f32 to vector<16x16xf32>
    %81 = arith.mulf %80, %79 : vector<16x16xf32>
    %82 = math.tanh %81 : vector<16x16xf32>
    %cst_50 = arith.constant 1.000000e+00 : f32
    %83 = vector.broadcast %cst_50 : f32 to vector<16x16xf32>
    %84 = arith.addf %83, %82 : vector<16x16xf32>
    %85 = arith.mulf %74, %84 : vector<16x16xf32>
    %86 = arith.truncf %85 : vector<16x16xf32> to vector<16x16xbf16>
    %c0_51 = arith.constant 0 : index
    %c0_52 = arith.constant 0 : index
    %87 = vector.load %arg10[%c0_51, %c0_52] : memref<16x4xbf16, #tpu.memory_space<vmem>>, vector<16x4xbf16>
    %cst_53 = arith.constant dense<0.000000e+00> : vector<16x4xf32>
    %88 = tpu.matmul %86, %87, %cst_53 {dimension_numbers = #tpu.dot_dimension_numbers<[1], [0], [0], [1], [0, 0, 1, 1], [], []>} : vector<16x16xbf16>, vector<16x4xbf16>, vector<16x4xf32> -> vector<16x4xf32>
    %c0_54 = arith.constant 0 : index
    %c0_55 = arith.constant 0 : index
    %89 = vector.load %arg11[%c0_54, %c0_55] : memref<1x4xf32, #tpu.memory_space<vmem>>, vector<1x4xf32>
    %90 = vector.broadcast %89 : vector<1x4xf32> to vector<16x4xf32>
    %91 = arith.addf %88, %90 : vector<16x4xf32>
    %c0_56 = arith.constant 0 : index
    %c0_57 = arith.constant 0 : index
    %92 = vector.load %arg12[%c0_56, %c0_57] : memref<1x4xf32, #tpu.memory_space<vmem>>, vector<1x4xf32>
    %93 = vector.broadcast %92 : vector<1x4xf32> to vector<16x4xf32>
    %94 = arith.mulf %91, %93 : vector<16x4xf32>
    %95 = arith.addf %6, %94 : vector<16x4xf32>
    %c0_58 = arith.constant 0 : index
    %c0_59 = arith.constant 0 : index
    %96 = vector.load %arg14[%c0_58, %c0_59] : memref<1x4xf32, #tpu.memory_space<vmem>>, vector<1x4xf32>
    %97 = vector.shape_cast %96 : vector<1x4xf32> to vector<1x4xf32>
    %98 = vector.broadcast %97 : vector<1x4xf32> to vector<16x4xf32>
    %c2_60 = arith.constant 2 : index
    %c0_61 = arith.constant 0 : index
    %99 = vector.load %arg23[%c2_60, %c0_61] : memref<24x4xf32, #tpu.memory_space<vmem>>, vector<16x4xf32>
    %c0_62 = arith.constant 0 : index
    %c0_63 = arith.constant 0 : index
    %100 = vector.load %arg13[%c0_62, %c0_63] : memref<3x4xf32, #tpu.memory_space<vmem>>, vector<1x4xf32>
    %101 = vector.broadcast %100 : vector<1x4xf32> to vector<16x4xf32>
    %102 = arith.mulf %99, %101 : vector<16x4xf32>
    %103 = arith.addf %98, %102 : vector<16x4xf32>
    %c3_64 = arith.constant 3 : index
    %c0_65 = arith.constant 0 : index
    %104 = vector.load %arg23[%c3_64, %c0_65] : memref<24x4xf32, #tpu.memory_space<vmem>>, vector<16x4xf32>
    %c1_66 = arith.constant 1 : index
    %c0_67 = arith.constant 0 : index
    %105 = vector.load %arg13[%c1_66, %c0_67] : memref<3x4xf32, #tpu.memory_space<vmem>>, vector<1x4xf32>
    %106 = vector.broadcast %105 : vector<1x4xf32> to vector<16x4xf32>
    %107 = arith.mulf %104, %106 : vector<16x4xf32>
    %108 = arith.addf %103, %107 : vector<16x4xf32>
    %c4_68 = arith.constant 4 : index
    %c0_69 = arith.constant 0 : index
    %109 = vector.load %arg23[%c4_68, %c0_69] : memref<24x4xf32, #tpu.memory_space<vmem>>, vector<16x4xf32>
    %c2_70 = arith.constant 2 : index
    %c0_71 = arith.constant 0 : index
    %110 = vector.load %arg13[%c2_70, %c0_71] : memref<3x4xf32, #tpu.memory_space<vmem>>, vector<1x4xf32>
    %111 = vector.broadcast %110 : vector<1x4xf32> to vector<16x4xf32>
    %112 = arith.mulf %109, %111 : vector<16x4xf32>
    %113 = arith.addf %108, %112 : vector<16x4xf32>
    %cst_72 = arith.constant dense<0.000000e+00> : vector<16xf32>
    %114 = vector.multi_reduction <add>, %113, %cst_72 [1] : vector<16x4xf32> to vector<16xf32>
    %115 = vector.shape_cast %114 : vector<16xf32> to vector<16x1xf32>
    %cst_73 = arith.constant 4.000000e+00 : f32
    %116 = vector.broadcast %cst_73 : f32 to vector<16x1xf32>
    %117 = arith.divf %115, %116 : vector<16x1xf32>
    %118 = vector.broadcast %117 : vector<16x1xf32> to vector<16x4xf32>
    %119 = arith.subf %113, %118 : vector<16x4xf32>
    %120 = arith.mulf %119, %119 : vector<16x4xf32>
    %cst_74 = arith.constant dense<0.000000e+00> : vector<16xf32>
    %121 = vector.multi_reduction <add>, %120, %cst_74 [1] : vector<16x4xf32> to vector<16xf32>
    %122 = vector.shape_cast %121 : vector<16xf32> to vector<16x1xf32>
    %cst_75 = arith.constant 4.000000e+00 : f32
    %123 = vector.broadcast %cst_75 : f32 to vector<16x1xf32>
    %124 = arith.divf %122, %123 : vector<16x1xf32>
    %cst_76 = arith.constant 9.99999997E-7 : f32
    %125 = vector.broadcast %cst_76 : f32 to vector<16x1xf32>
    %126 = arith.addf %124, %125 : vector<16x1xf32>
    %127 = math.rsqrt %126 : vector<16x1xf32>
    %128 = vector.broadcast %127 : vector<16x1xf32> to vector<16x4xf32>
    %129 = arith.mulf %119, %128 : vector<16x4xf32>
    %c0_77 = arith.constant 0 : index
    %c0_78 = arith.constant 0 : index
    %130 = vector.load %arg15[%c0_77, %c0_78] : memref<1x4xf32, #tpu.memory_space<vmem>>, vector<1x4xf32>
    %131 = vector.broadcast %130 : vector<1x4xf32> to vector<16x4xf32>
    %132 = arith.mulf %129, %131 : vector<16x4xf32>
    %c0_79 = arith.constant 0 : index
    %c0_80 = arith.constant 0 : index
    %133 = vector.load %arg16[%c0_79, %c0_80] : memref<1x4xf32, #tpu.memory_space<vmem>>, vector<1x4xf32>
    %134 = vector.broadcast %133 : vector<1x4xf32> to vector<16x4xf32>
    %135 = arith.addf %132, %134 : vector<16x4xf32>
    %136 = arith.truncf %135 : vector<16x4xf32> to vector<16x4xbf16>
    %c0_81 = arith.constant 0 : index
    %c0_82 = arith.constant 0 : index
    %137 = vector.load %arg17[%c0_81, %c0_82] : memref<4x16xbf16, #tpu.memory_space<vmem>>, vector<4x16xbf16>
    %cst_83 = arith.constant dense<0.000000e+00> : vector<16x16xf32>
    %138 = tpu.matmul %136, %137, %cst_83 {dimension_numbers = #tpu.dot_dimension_numbers<[1], [0], [0], [1], [0, 0, 1, 1], [], []>} : vector<16x4xbf16>, vector<4x16xbf16>, vector<16x16xf32> -> vector<16x16xf32>
    %c0_84 = arith.constant 0 : index
    %c0_85 = arith.constant 0 : index
    %139 = vector.load %arg18[%c0_84, %c0_85] : memref<1x16xf32, #tpu.memory_space<vmem>>, vector<1x16xf32>
    %140 = vector.broadcast %139 : vector<1x16xf32> to vector<16x16xf32>
    %141 = arith.addf %138, %140 : vector<16x16xf32>
    %cst_86 = arith.constant 5.000000e-01 : f32
    %142 = vector.broadcast %cst_86 : f32 to vector<16x16xf32>
    %143 = arith.mulf %142, %141 : vector<16x16xf32>
    %cst_87 = arith.constant 4.471500e-02 : f32
    %144 = vector.broadcast %cst_87 : f32 to vector<16x16xf32>
    %145 = arith.mulf %144, %141 : vector<16x16xf32>
    %146 = arith.mulf %145, %141 : vector<16x16xf32>
    %147 = arith.mulf %146, %141 : vector<16x16xf32>
    %148 = arith.addf %141, %147 : vector<16x16xf32>
    %cst_88 = arith.constant 0.797884583 : f32
    %149 = vector.broadcast %cst_88 : f32 to vector<16x16xf32>
    %150 = arith.mulf %149, %148 : vector<16x16xf32>
    %151 = math.tanh %150 : vector<16x16xf32>
    %cst_89 = arith.constant 1.000000e+00 : f32
    %152 = vector.broadcast %cst_89 : f32 to vector<16x16xf32>
    %153 = arith.addf %152, %151 : vector<16x16xf32>
    %154 = arith.mulf %143, %153 : vector<16x16xf32>
    %155 = arith.truncf %154 : vector<16x16xf32> to vector<16x16xbf16>
    %c0_90 = arith.constant 0 : index
    %c0_91 = arith.constant 0 : index
    %156 = vector.load %arg19[%c0_90, %c0_91] : memref<16x4xbf16, #tpu.memory_space<vmem>>, vector<16x4xbf16>
    %cst_92 = arith.constant dense<0.000000e+00> : vector<16x4xf32>
    %157 = tpu.matmul %155, %156, %cst_92 {dimension_numbers = #tpu.dot_dimension_numbers<[1], [0], [0], [1], [0, 0, 1, 1], [], []>} : vector<16x16xbf16>, vector<16x4xbf16>, vector<16x4xf32> -> vector<16x4xf32>
    %c0_93 = arith.constant 0 : index
    %c0_94 = arith.constant 0 : index
    %158 = vector.load %arg20[%c0_93, %c0_94] : memref<1x4xf32, #tpu.memory_space<vmem>>, vector<1x4xf32>
    %159 = vector.broadcast %158 : vector<1x4xf32> to vector<16x4xf32>
    %160 = arith.addf %157, %159 : vector<16x4xf32>
    %c0_95 = arith.constant 0 : index
    %c0_96 = arith.constant 0 : index
    %161 = vector.load %arg21[%c0_95, %c0_96] : memref<1x4xf32, #tpu.memory_space<vmem>>, vector<1x4xf32>
    %162 = vector.broadcast %161 : vector<1x4xf32> to vector<16x4xf32>
    %163 = arith.mulf %160, %162 : vector<16x4xf32>
    %164 = arith.addf %95, %163 : vector<16x4xf32>
    %c0_97 = arith.constant 0 : index
    %c0_98 = arith.constant 0 : index
    %c0_99 = arith.constant 0 : index
    %165 = vector.load %arg22[%c0_97, %c0_98, %c0_99] : memref<1x16x4xf32, #tpu.memory_space<vmem>>, vector<1x16x4xf32>
    %166 = vector.shape_cast %165 : vector<1x16x4xf32> to vector<16x4xf32>
    %167 = vector.shape_cast %164 : vector<16x4xf32> to vector<1x16x4xf32>
    tpu.vector_store %arg22[%c0_97, %c0_98, %c0_99], %167 {strides = array<i32>} : memref<1x16x4xf32, #tpu.memory_space<vmem>>, vector<1x16x4xf32>,
    return
  }
  func.func @transform_0(%arg0: i32, %arg1: i32) -> (i32, i32, i32) {
    %c0_i32 = arith.constant 0 : i32
    %c0_i32_0 = arith.constant 0 : i32
    return %arg0, %arg1, %c0_i32 : i32, i32, i32
  }
  func.func @transform_1(%arg0: i32, %arg1: i32) -> (i32, i32, i32) {
    %c1_i32 = arith.constant 1 : i32
    %0 = arith.addi %arg1, %c1_i32 : i32
    %c2_i32 = arith.constant 2 : i32
    %1 = arith.muli %0, %c2_i32 : i32
    %c0_i32 = arith.constant 0 : i32
    %c0_i32_0 = arith.constant 0 : i32
    return %arg0, %1, %c0_i32 : i32, i32, i32
  }
  func.func @transform_2(%arg0: i32, %arg1: i32) -> (i32, i32) {
    %c0_i32 = arith.constant 0 : i32
    %c0_i32_0 = arith.constant 0 : i32
    %c0_i32_1 = arith.constant 0 : i32
    return %c0_i32, %c0_i32_0 : i32, i32
  }
  func.func @transform_3(%arg0: i32, %arg1: i32) -> (i32, i32) {
    %c0_i32 = arith.constant 0 : i32
    %c0_i32_0 = arith.constant 0 : i32
    %c0_i32_1 = arith.constant 0 : i32
    return %c0_i32, %c0_i32_0 : i32, i32
  }
  func.func @transform_4(%arg0: i32, %arg1: i32) -> (i32, i32) {
    %c0_i32 = arith.constant 0 : i32
    %c0_i32_0 = arith.constant 0 : i32
    %c0_i32_1 = arith.constant 0 : i32
    return %c0_i32, %c0_i32_0 : i32, i32
  }
  func.func @transform_5(%arg0: i32, %arg1: i32) -> (i32, i32) {
    %c0_i32 = arith.constant 0 : i32
    %c0_i32_0 = arith.constant 0 : i32
    %c0_i32_1 = arith.constant 0 : i32
    return %c0_i32, %c0_i32_0 : i32, i32
  }
  func.func @transform_6(%arg0: i32, %arg1: i32) -> (i32, i32) {
    %c0_i32 = arith.constant 0 : i32
    %c0_i32_0 = arith.constant 0 : i32
    %c0_i32_1 = arith.constant 0 : i32
    return %c0_i32, %c0_i32_0 : i32, i32
  }
  func.func @transform_7(%arg0: i32, %arg1: i32) -> (i32, i32) {
    %c0_i32 = arith.constant 0 : i32
    %c0_i32_0 = arith.constant 0 : i32
    %c0_i32_1 = arith.constant 0 : i32
    return %c0_i32, %c0_i32_0 : i32, i32
  }
  func.func @transform_8(%arg0: i32, %arg1: i32) -> (i32, i32) {
    %c0_i32 = arith.constant 0 : i32
    %c0_i32_0 = arith.constant 0 : i32
    %c0_i32_1 = arith.constant 0 : i32
    return %c0_i32, %c0_i32_0 : i32, i32
  }
  func.func @transform_9(%arg0: i32, %arg1: i32) -> (i32, i32) {
    %c0_i32 = arith.constant 0 : i32
    %c0_i32_0 = arith.constant 0 : i32
    %c0_i32_1 = arith.constant 0 : i32
    return %c0_i32, %c0_i32_0 : i32, i32
  }
  func.func @transform_10(%arg0: i32, %arg1: i32) -> (i32, i32) {
    %c0_i32 = arith.constant 0 : i32
    %c0_i32_0 = arith.constant 0 : i32
    %c0_i32_1 = arith.constant 0 : i32
    return %c0_i32, %c0_i32_0 : i32, i32
  }
  func.func @transform_11(%arg0: i32, %arg1: i32) -> (i32, i32) {
    %c0_i32 = arith.constant 0 : i32
    %c0_i32_0 = arith.constant 0 : i32
    %c0_i32_1 = arith.constant 0 : i32
    return %c0_i32, %c0_i32_0 : i32, i32
  }
  func.func @transform_12(%arg0: i32, %arg1: i32) -> (i32, i32) {
    %c0_i32 = arith.constant 0 : i32
    %c0_i32_0 = arith.constant 0 : i32
    %c0_i32_1 = arith.constant 0 : i32
    return %c0_i32, %c0_i32_0 : i32, i32
  }
  func.func @transform_13(%arg0: i32, %arg1: i32) -> (i32, i32) {
    %c0_i32 = arith.constant 0 : i32
    %c0_i32_0 = arith.constant 0 : i32
    %c0_i32_1 = arith.constant 0 : i32
    return %c0_i32, %c0_i32_0 : i32, i32
  }
  func.func @transform_14(%arg0: i32, %arg1: i32) -> (i32, i32) {
    %c0_i32 = arith.constant 0 : i32
    %c0_i32_0 = arith.constant 0 : i32
    %c0_i32_1 = arith.constant 0 : i32
    return %c0_i32, %c0_i32_0 : i32, i32
  }
  func.func @transform_15(%arg0: i32, %arg1: i32) -> (i32, i32) {
    %c0_i32 = arith.constant 0 : i32
    %c0_i32_0 = arith.constant 0 : i32
    %c0_i32_1 = arith.constant 0 : i32
    return %c0_i32, %c0_i32_0 : i32, i32
  }
  func.func @transform_16(%arg0: i32, %arg1: i32) -> (i32, i32) {
    %c0_i32 = arith.constant 0 : i32
    %c0_i32_0 = arith.constant 0 : i32
    %c0_i32_1 = arith.constant 0 : i32
    return %c0_i32, %c0_i32_0 : i32, i32
  }
  func.func @transform_17(%arg0: i32, %arg1: i32) -> (i32, i32) {
    %c0_i32 = arith.constant 0 : i32
    %c0_i32_0 = arith.constant 0 : i32
    %c0_i32_1 = arith.constant 0 : i32
    return %c0_i32, %c0_i32_0 : i32, i32
  }
  func.func @transform_18(%arg0: i32, %arg1: i32) -> (i32, i32) {
    %c0_i32 = arith.constant 0 : i32
    %c0_i32_0 = arith.constant 0 : i32
    %c0_i32_1 = arith.constant 0 : i32
    return %c0_i32, %c0_i32_0 : i32, i32
  }
  func.func @transform_19(%arg0: i32, %arg1: i32) -> (i32, i32) {
    %c0_i32 = arith.constant 0 : i32
    %c0_i32_0 = arith.constant 0 : i32
    %c0_i32_1 = arith.constant 0 : i32
    return %c0_i32, %c0_i32_0 : i32, i32
  }
  func.func @transform_20(%arg0: i32, %arg1: i32) -> (i32, i32, i32) {
    %c0_i32 = arith.constant 0 : i32
    %c0_i32_0 = arith.constant 0 : i32
    return %arg0, %arg1, %c0_i32 : i32, i32, i32
  }
}

</mosaic_0001>

<bundles_post_ra>
// kernel: tpu_custom_call.1
= control target key start
LH: loop header
LB: loop body
LE: loop exit
PB: predicated region body
PF: predicated region fallthrough
CT: control target
= control target key end

     0   :  { %s1603_s22 = smov 0   ;;  %s1605_s23 = smov 0   ;;  %s1757_s0 = inlined_call_operand.vmem [shape: f32[2,24,4], index: 0, kind: input, shape index: {}]   ;;  %s1758_s1 = inlined_call_operand.vmem [shape: f32[2,24,4], index: 1, kind: input, shape index: {}]   ;;  %s1759_s2 = inlined_call_operand.vmem [shape: f32[7,4], index: 2, kind: input, shape index: {}]   ;;  %s1760_s3 = inlined_call_operand.vmem [shape: f32[1,4], index: 3, kind: input, shape index: {}]   ;;  %s1761_s4 = inlined_call_operand.vmem [shape: f32[1,4], index: 4, kind: input, shape index: {}]   ;;  %s1762_s5 = inlined_call_operand.vmem [shape: f32[1,4], index: 5, kind: input, shape index: {}]   ;;  %s1763_s6 = inlined_call_operand.vmem [shape: bf16[4,16], index: 6, kind: input, shape index: {}]   ;;  %s1764_s7 = inlined_call_operand.vmem [shape: f32[1,16], index: 7, kind: input, shape index: {}]   ;;  %s1765_s8 = inlined_call_operand.vmem [shape: bf16[16,4], index: 8, kind: input, shape index: {}]   ;;  %s1766_s9 = inlined_call_operand.vmem [shape: f32[1,4], index: 9, kind: input, shape index: {}]   ;;  %s1767_s10 = inlined_call_operand.vmem [shape: f32[1,4], index: 10, kind: input, shape index: {}]   ;;  %s1768_s11 = inlined_call_operand.vmem [shape: f32[3,4], index: 11, kind: input, shape index: {}]   ;;  %s1769_s12 = inlined_call_operand.vmem [shape: f32[1,4], index: 12, kind: input, shape index: {}]   ;;  %s1770_s13 = inlined_call_operand.vmem [shape: f32[1,4], index: 13, kind: input, shape index: {}]   ;;  %s1771_s14 = inlined_call_operand.vmem [shape: f32[1,4], index: 14, kind: input, shape index: {}]   ;;  %s1772_s15 = inlined_call_operand.vmem [shape: bf16[4,16], index: 15, kind: input, shape index: {}]   ;;  %s1773_s16 = inlined_call_operand.vmem [shape: f32[1,16], index: 16, kind: input, shape index: {}]   ;;  %s1774_s17 = inlined_call_operand.vmem [shape: bf16[16,4], index: 17, kind: input, shape index: {}]   ;;  %s1775_s18 = inlined_call_operand.vmem [shape: f32[1,4], index: 18, kind: input, shape index: {}]   ;;  %s1776_s19 = inlined_call_operand.vmem [shape: f32[1,4], index: 19, kind: input, shape index: {}]   ;;  %s1777_s20 = inlined_call_operand.vmem [shape: f32[2,16,4], index: 20, kind: output, shape index: {}]  }
   0x1   :  { %1781 = sst [smem:[#allocation6_spill]] %s1757_s0 }
   0x2   :  { %1782 = sst [smem:[#allocation7_spill]] %s1758_s1  ;;  %s1601_s1 = smov 0  }
   0x3   :  { %1783 = sst [smem:[#allocation8_spill]] %s1759_s2 }
   0x4   :  { %1784 = sst [smem:[#allocation9_spill]] %s1760_s3 }
   0x5   :  { %1785 = sst [smem:[#allocation10_spill]] %s1761_s4 }
   0x6 LB: > { %1786 = sst [smem:[#allocation3_spill]] %s1488_s22  ;;  %s42_s24 = sadd.s32 1, %s1488_s22  ;;  %s1492_s23 = sphi %s1605_s23, %s30_s23   ;;  %s1488_s22 = sphi %s1603_s22, %s1796_s22   ;;  %s1484_s1 = sphi %s1601_s1, %s1795_s1  }
   0x7   : > { %1787 = sst [smem:[#allocation4_spill]] %s1492_s23  ;;  %p1353_p0 = scmp.ge.s32.totalorder %s1492_s23, 1 }
   0x8   : > { %p44_p1 = scmp.ge.s32.totalorder %s42_s24, 2  ;;  %p614_p2 = scmp.lt.s32.totalorder %s1492_s23, 3 }
   0xa   : > { %s1798_s24 = smov (%p44_p1, %s42_s24), 0  ;;  %p615_p3 = pnand %p1353_p0, %p614_p2 }
   0xb   : > { %1788 = sst [smem:[#allocation5_spill]] %s1798_s24  ;;  %p699_p4 = scmp.lt.s32.totalorder (!%p615_p3), %s1484_s1, 1  ;;  %vm737_vm0 = vcmask (!%p615_p3), 31744   ;;  %vm741_vm1 = vcmask (!%p615_p3), 29696   ;;  %v1375_v7 = vld [vmem:[%s1768_s11] ss:$0 sm:$0xff] (!%p615_p3) }
   0xc   : > { %618 = sbr.rel (%p615_p3) target bundleno = 839 (0x347), region = 100  ;;  %s1789_s26 = sld [smem:[#allocation6_spill]] (!%p615_p3)  ;;  %v1376_v8 = vld [vmem:[%s1768_s11 + $0x1] ss:$0 sm:$0xff] (!%p615_p3)  ;;  %v1374_v11 = vld [vmem:[%s1769_s12] ss:$0 sm:$0xff] (!%p615_p3) }
   0xd   : > { %s1790_s30 = sld [smem:[#allocation7_spill]] (!%p615_p3)  ;;  %s1791_s22 = sld [smem:[#allocation9_spill]] (!%p615_p3)  ;;  %v1377_v16 = vld [vmem:[%s1768_s11 + $0x2] ss:$0 sm:$0xff] (!%p615_p3)  ;;  %vm884_vm2 = vcmask (!%p615_p3), 1041408   ;;  %vm1495_vm3 = vmmov (!%p615_p3), 0  }
   0xe   : > { %s1793_s25 = sld [smem:[#allocation10_spill]] (!%p615_p3)  ;;  %vm963_vm4 = vcmask (!%p615_p3), 130048  }
  0x13   : > { %s1800_s1 = smov (!%p699_p4, %s1484_s1), 1  ;;  %v1358_v3 = vld [vmem:[%s1791_s22] ss:$0 sm:$0xff] }
  0x14   : > { %s1423_s2 = smul.u32 24, %s1800_s1  ;;  %s1390_s21 = sshll.u32 %s1800_s1, 4 }
  0x16   : > { %s706_s27 = scalar_lea.vmem %s1789_s26, %s1423_s2  ;;  %s1389_s28 = sadd.s32 16, %s1423_s2 }
  0x17   : > { %v735_v0 = vld [vmem:[%s706_s27] sm:$0xff]  ;;  %v736_v1 = vld [vmem:[%s706_s27 + $0x8] sm:$0xff]  ;;  %s721_s0 = scalar_lea.vmem %s1790_s30, %s1389_s28  ;;  %s1792_s2 = sld [smem:[#allocation8_spill]] }
  0x18   : > { %738 = vst.msk [vmem:[#allocation2] sm:$0xff] %vm737_vm0, %v735_v0  ;;  %739 = vst.msk [vmem:[#allocation2 + $0x8] sm:$0xff] %vm737_vm0, %v736_v1  ;;  %v740_v2 = vld [vmem:[%s721_s0] sm:$0x3f]  ;;  %s732_s26 = scalar_lea.vmem %s1777_s20, %s1390_s21 }
  0x19   : > { %742 = vst.msk [vmem:[#allocation2 + $0x10] sm:$0x3f] %vm741_vm1, %v740_v2 }
  0x1d   : > { %v1359_v4 = vld [vmem:[%s1792_s2] ss:$0 sm:$0xff]  ;;  %v1360_v5 = vld [vmem:[%s1792_s2 + $0x1] ss:$0 sm:$0xff]  ;;  %v1361_v6 = vld [vmem:[%s1792_s2 + $0x2] ss:$0 sm:$0xff] }
  0x1e   : > { %v1362_v17 = vld [vmem:[%s1792_s2 + $0x3] ss:$0 sm:$0xff]  ;;  %v1363_v27 = vld [vmem:[%s1792_s2 + $0x4] ss:$0 sm:$0xff]  ;;  %v1364_v37 = vld [vmem:[%s1792_s2 + $0x5] ss:$0 sm:$0xff] }
  0x1f   : > { %v752_v9 = vld [vmem:[#allocation2] sm:$0xff]  ;;  %v753_v20 = vld [vmem:[#allocation2 + $0x8] sm:$0xff] }
  0x20   : > { %v763_v10 = vld [vmem:[#allocation2 + $0x1] sm:$0xff]  ;;  %v759_v13 = vmul.f32 %v1359_v4, %v752_v9  ;;  %v760_v24 = vmul.f32 %v1359_v4, %v753_v20  ;;  %v764_v25 = vld [vmem:[#allocation2 + $0x9] sm:$0xff] }
  0x21   : > { %v1651_v12 = vld [vmem:[#allocation2 + $0x3] sm:$0xff]  ;;  %v770_v14 = vmul.f32 %v1360_v5, %v763_v10  ;;  %v1663_v30 = vld [vmem:[#allocation2 + $0xb] sm:$0xff]  ;;  %v771_v31 = vmul.f32 %v1360_v5, %v764_v25 }
  0x22   : > { %v774_v15 = vld [vmem:[#allocation2 + $0x2] sm:$0xff]  ;;  %v1040_v19 = vmul.f32 %v1376_v8, %v1651_v12  ;;  %v761_v21 = vadd.f32 %v1358_v3, %v759_v13  ;;  %v775_v26 = vld [vmem:[#allocation2 + $0xa] sm:$0xff]  ;;  %v790_v33 = vmul.f32 %v1362_v17, %v1651_v12  ;;  %v762_v34 = vadd.f32 %v1358_v3, %v760_v24 }
  0x23   : > { %v1031_v18 = vmul.f32 %v1375_v7, %v774_v15  ;;  %v781_v22 = vmul.f32 %v1361_v6, %v774_v15  ;;  %v794_v23 = vld [vmem:[#allocation2 + $0x4] sm:$0xff]  ;;  %v782_v35 = vmul.f32 %v1361_v6, %v775_v26  ;;  %v795_v39 = vld [vmem:[#allocation2 + $0xc] sm:$0xff]  ;;  %v1032_v40 = vmul.f32 %v1375_v7, %v775_v26 }
  0x24   : > { %v1049_v29 = vmul.f32 %v1377_v16, %v794_v23  ;;  %v772_v32 = vadd.f32 %v770_v14, %v761_v21  ;;  %v805_v36 = vld [vmem:[#allocation2 + $0x5] sm:$0xff]  ;;  %v1041_v41 = vmul.f32 %v1376_v8, %v1663_v30  ;;  %v801_v43 = vmul.f32 %v1363_v27, %v794_v23  ;;  %v806_v49 = vld [vmem:[#allocation2 + $0xd] sm:$0xff] }
  0x25   : > { %v1033_v28 = vadd.f32 %v1374_v11, %v1031_v18  ;;  %v773_v44 = vadd.f32 %v771_v31, %v762_v34  ;;  %v791_v45 = vmul.f32 %v1362_v17, %v1663_v30  ;;  %v816_v46 = vld [vmem:[#allocation2 + $0x6] sm:$0xff]  ;;  %v1034_v50 = vadd.f32 %v1374_v11, %v1032_v40  ;;  %v817_v57 = vld [vmem:[#allocation2 + $0xe] sm:$0xff]  ;;  %v873_v31 = vld [vmem:[%s1763_s6] sm:$0x3] }
  0x26   : > { %v783_v42 = vadd.f32 %v781_v22, %v772_v32  ;;  %v1365_v47 = vld [vmem:[%s1792_s2 + $0x6] ss:$0 sm:$0xff]  ;;  %v1050_v51 = vmul.f32 %v1377_v16, %v795_v39  ;;  %v812_v53 = vmul.f32 %v1364_v37, %v805_v36  ;;  %v802_v55 = vmul.f32 %v1363_v27, %v795_v39 }
  0x27   : > { %v1042_v38 = vadd.f32 %v1040_v19, %v1033_v28  ;;  %v784_v54 = vadd.f32 %v782_v35, %v773_v44  ;;  %v1043_v58 = vadd.f32 %v1041_v41, %v1034_v50  ;;  %v823_v60 = vmul.f32 %v1365_v47, %v816_v46 }
  0x28   : > { %v792_v52 = vadd.f32 %v790_v33, %v783_v42  ;;  %v813_v62 = vmul.f32 %v1364_v37, %v806_v49  ;;  %v824_v2 = vmul.f32 %v1365_v47, %v817_v57  ;;  %v1494_v32 = vmov 0.0  }
  0x29   : > { %v1051_v48 = vadd.f32 %v1049_v29, %v1042_v38  ;;  %v793_v61 = vadd.f32 %v791_v45, %v784_v54  ;;  %v1052_v63 = vadd.f32 %v1050_v51, %v1043_v58  ;;  %1399 = vmatprep.subr.bf16.mxu0 %v1494_v32  ;;  %v886_v33 = vsel %vm884_vm2, %v873_v31, 0  ;;  %1405 = vmatprep.subr.bf16.mxu1 %v1494_v32 }
  0x2a   : > { %v803_v59 = vadd.f32 %v801_v43, %v792_v52  ;;  %1400 = vmatpush3.bf16.msra.mxu0 %v886_v33  ;;  %1401 = vmatprep.mubr.msk.bf16.mxu0 %vm1495_vm3, %v1494_v32 }
  0x2b   : > { %v1053_v56 = vsel %vm737_vm0, %v1051_v48, 0.0  ;;  %v804_v1 = vadd.f32 %v802_v55, %v793_v61  ;;  %v1056_v3 = vsel %vm737_vm0, %v1052_v63, 0.0  ;;  %1411 = vmatprep.subr.bf16.mxu0 %v1494_v32  ;;  %1407 = vmatprep.mubr.msk.bf16.mxu1 %vm1495_vm3, %v1494_v32  ;;  %v1378_v61 = vld [vmem:[%s1770_s13] ss:$0 sm:$0xff] }
  0x2c   : > { %1054 = vadd.xlane.f32.xlu1 %v1053_v56  ;;  %v814_v0 = vadd.f32 %v812_v53, %v803_v59  ;;  %v1367_v53 = vld [vmem:[%s1762_s5] ss:$0 sm:$0xff] }
  0x2d   : > { %v815_v5 = vadd.f32 %v813_v62, %v804_v1  ;;  %v1098_v56 = vld [vmem:[%s1772_s15] sm:$0x3] }
  0x2e   : > { %v825_v4 = vadd.f32 %v823_v60, %v814_v0 }
  0x2f   : > { %v826_v7 = vadd.f32 %v824_v2, %v815_v5  ;;  %v1379_v2 = vld [vmem:[%s1771_s14] ss:$0 sm:$0xff] }
  0x30   : > { %1057 = vadd.xlane.f32.xlu1 %v1056_v3  ;;  %v827_v6 = vsel %vm737_vm0, %v825_v4, 0.0 }
  0x31   : > { %828 = vadd.xlane.f32.xlu0 %v827_v6  ;;  %v830_v8 = vsel %vm737_vm0, %v826_v7, 0.0  ;;  %v1452_v6 = vld [vmem:[%s1765_s8] sm:$0xff]  }
  0x32   : > { %1406 = vmatpush3.bf16.msra.mxu1 %v1452_v6  ;;  %v1382_v6 = vld [vmem:[%s1775_s18] ss:$0 sm:$0xff] }
  0x33   : > { %1417 = vmatprep.subr.bf16.mxu1 %v1494_v32 }
  0x35   : > { %831 = vadd.xlane.f32.xlu0 %v830_v8 }
  0xb9   : > { %v1055_v9 = vpop.xlane.xlu1 %1054 }
  0xba   : > { %v1059_v10 = vmul.f32 0.25, %v1055_v9 }
  0xbc   : > { %v1061_v15 = vsub.f32 %v1051_v48, %v1059_v10  ;;  %v1366_v48 = vld [vmem:[%s1793_s25] ss:$0 sm:$0xff] }
  0xbd   : > { %v1058_v11 = vpop.xlane.xlu1 %1057 }
  0xbe   : > { %v829_v13 = vpop.xlane.xlu0 %828  ;;  %v1060_v16 = vmul.f32 0.25, %v1058_v11  ;;  %v1063_v22 = vmul.f32 %v1061_v15, %v1061_v15 }
  0xbf   : > { %v834_v14 = vmul.f32 0.25, %v829_v13 }
  0xc0   : > { %v1062_v20 = vsub.f32 %v1052_v63, %v1060_v16  ;;  %v1065_v25 = vsel %vm737_vm0, %v1063_v22, 0.0  ;;  %v1110_v63 = vsel %vm884_vm2, %v1098_v56, 0 }
  0xc1   : > { %v836_v17 = vsub.f32 %v825_v4, %v834_v14 }
  0xc2   : > { %v832_v18 = vpop.xlane.xlu0 %831  ;;  %v1064_v27 = vmul.f32 %v1062_v20, %v1062_v20 }
  0xc3   : > { %v835_v19 = vmul.f32 0.25, %v832_v18  ;;  %v838_v21 = vmul.f32 %v836_v17, %v836_v17  ;;  %v1380_v18 = vld [vmem:[%s1773_s16] ss:$0 sm:$0xff] }
  0xc4   : > { %v1068_v29 = vsel %vm737_vm0, %v1064_v27, 0.0 }
  0xc5   : > { %v837_v23 = vsub.f32 %v826_v7, %v835_v19  ;;  %v840_v24 = vsel %vm737_vm0, %v838_v21, 0.0  ;;  %v1368_v7 = vld [vmem:[%s1764_s7] ss:$0 sm:$0xff] }
  0xc6   : > { %841 = vadd.xlane.f32.xlu0 %v840_v24 }
  0xc7   : > { %v839_v26 = vmul.f32 %v837_v23, %v837_v23 }
  0xc9   : > { %v843_v28 = vsel %vm737_vm0, %v839_v26, 0.0 }
  0xca   : > { %1066 = vadd.xlane.f32.xlu0 %v1065_v25  ;;  %844 = vadd.xlane.f32.xlu1 %v843_v28 }
  0xce   : > { %1069 = vadd.xlane.f32.xlu1 %v1068_v29 }
 0x153   : > { %v842_v34 = vpop.xlane.xlu0 %841 }
 0x154   : > { %v846_v35 = vmul.f32 0.25, %v842_v34 }
 0x156   : > { %v848_v36 = vadd.f32 1e-06, %v846_v35 }
 0x157   : > { %v845_v37 = vpop.xlane.xlu1 %844  ;;  %v1067_v38 = vpop.xlane.xlu0 %1066 }
 0x158   : > { %1454 = vrsqrt.f32 %v848_v36  ;;  %v847_v39 = vmul.f32 0.25, %v845_v37  ;;  %v1071_v40 = vmul.f32 0.25, %v1067_v38 }
 0x15a   : > { %v849_v41 = vadd.f32 1e-06, %v847_v39  ;;  %v1073_v42 = vadd.f32 1e-06, %v1071_v40 }
 0x15b   : > { %v1070_v43 = vpop.xlane.xlu1 %1069 }
 0x15c   : > { %1456 = vrsqrt.f32 %v849_v41  ;;  %v1072_v44 = vmul.f32 0.25, %v1070_v43 }
 0x15d   : > { %1458 = vrsqrt.f32 %v1073_v42 }
 0x15e   : > { %v1074_v45 = vadd.f32 1e-06, %v1072_v44 }
 0x160   : > { %1460 = vrsqrt.f32 %v1074_v45 }
 0x162   : > { %v1455_v46 = vpop.eup %1454 }
 0x163   : > { %v852_v47 = vmul.f32 %v1455_v46, %v836_v17 }
 0x165   : > { %v861_v51 = vmul.f32 %v1366_v48, %v852_v47 }
 0x166   : > { %v1457_v49 = vpop.eup %1456 }
 0x167   : > { %v853_v50 = vmul.f32 %v1457_v49, %v837_v23  ;;  %v1459_v52 = vpop.eup %1458  ;;  %v870_v59 = vadd.f32 %v1367_v53, %v861_v51 }
 0x168   : > { %v1077_v57 = vmul.f32 %v1459_v52, %v1061_v15  ;;  %v1453_v52 = vld [vmem:[%s1774_s17] sm:$0xff]  }
 0x169   : > { %v862_v54 = vmul.f32 %v1366_v48, %v853_v50 }
 0x16a   : > { %v1461_v55 = vpop.eup %1460  ;;  %v1086_v1 = vmul.f32 %v1378_v61, %v1077_v57 }
 0x16b   : > { %v1078_v58 = vmul.f32 %v1461_v55, %v1062_v20  ;;  %v871_v60 = vadd.f32 %v1367_v53, %v862_v54 }
 0x16c   : > { %v1095_v4 = vadd.f32 %v1379_v2, %v1086_v1 }
 0x16d   : > { %v1087_v62 = vmul.f32 %v1378_v61, %v1078_v58  ;;  %v872_v0 = vpack.c.bf16 %v871_v60, %v870_v59 }
 0x16f   : > { %1402 = vmatmul.mubr.msk.bf16.vlgmr.msra.gmra.mrb[0].mxu0 %vm737_vm0, %v872_v0  ;;  %v1096_v3 = vadd.f32 %v1379_v2, %v1087_v62  ;;  %v1370_v0 = vld [vmem:[%s1766_s9] ss:$0 sm:$0xff] }
 0x170   : > { %1412 = vmatpush3.bf16.msra.mxu0 %v1110_v63  ;;  %1413 = vmatprep.mubr.msk.bf16.mxu0 %vm1495_vm3, %v1494_v32 }
 0x171   : > { %v1097_v5 = vpack.c.bf16 %v1096_v3, %v1095_v4 }
 0x177   : > { %1414 = vmatmul.mubr.msk.bf16.vlgmr.msra.gmra.mrb[4].mxu0 %vm737_vm0, %v1097_v5 }
 0x242   : > { %v922_v8 = vpop.f32.mrb[0].mxu0 }
 0x243   : > { %v923_v9 = vadd.f32 %v1368_v7, %v922_v8  ;;  %v1403_v10 = vpop.f32.mrb[1].mxu0 }
 0x244   : > { %v925_v11 = vpop.f32.mrb[2].mxu0 }
 0x245   : > { %v931_v13 = vmul.f32 0.044715, %v923_v9  ;;  %v926_v14 = vadd.f32 %v1368_v7, %v925_v11  ;;  %v1404_v15 = vpop.f32.mrb[3].mxu0  ;;  %v929_v47 = vmul.f32 0.5, %v923_v9 }
 0x247   : > { %v933_v16 = vmul.f32 %v931_v13, %v923_v9  ;;  %v932_v17 = vmul.f32 0.044715, %v926_v14  ;;  %v930_v48 = vmul.f32 0.5, %v926_v14 }
 0x249   : > { %v935_v19 = vmul.f32 %v933_v16, %v923_v9  ;;  %v934_v20 = vmul.f32 %v932_v17, %v926_v14 }
 0x24a   : > { %v1146_v21 = vpop.f32.mrb[4].mxu0 }
 0x24b   : > { %v937_v22 = vadd.f32 %v935_v19, %v923_v9  ;;  %v936_v23 = vmul.f32 %v934_v20, %v926_v14  ;;  %v1147_v24 = vadd.f32 %v1380_v18, %v1146_v21  ;;  %v1415_v25 = vpop.f32.mrb[5].mxu0  ;;  %v1385_v9 = vld [vmem:[%s1776_s19] ss:$0 sm:$0xff] }
 0x24c   : > { %v1149_v26 = vpop.f32.mrb[6].mxu0 }
 0x24d   : > { %v939_v27 = vmul.f32 0.7978846, %v937_v22  ;;  %v938_v28 = vadd.f32 %v936_v23, %v926_v14  ;;  %v1155_v29 = vmul.f32 0.044715, %v1147_v24  ;;  %v1416_v31 = vpop.f32.mrb[7].mxu0  ;;  %v1150_v33 = vadd.f32 %v1380_v18, %v1149_v26 }
 0x24e   : > { %v1153_v57 = vmul.f32 0.5, %v1147_v24 }
 0x24f   : > { %1462 = vtanh.f32 %v939_v27  ;;  %v940_v34 = vmul.f32 0.7978846, %v938_v28  ;;  %v1157_v35 = vmul.f32 %v1155_v29, %v1147_v24  ;;  %v1156_v36 = vmul.f32 0.044715, %v1150_v33 }
 0x250   : > { %v1154_v58 = vmul.f32 0.5, %v1150_v33 }
 0x251   : > { %1464 = vtanh.f32 %v940_v34  ;;  %v1159_v37 = vmul.f32 %v1157_v35, %v1147_v24  ;;  %v1158_v38 = vmul.f32 %v1156_v36, %v1150_v33 }
 0x253   : > { %v1161_v39 = vadd.f32 %v1159_v37, %v1147_v24  ;;  %v1160_v40 = vmul.f32 %v1158_v38, %v1150_v33 }
 0x255   : > { %v1163_v41 = vmul.f32 0.7978846, %v1161_v39  ;;  %v1162_v42 = vadd.f32 %v1160_v40, %v1150_v33 }
 0x257   : > { %1466 = vtanh.f32 %v1163_v41  ;;  %v1164_v43 = vmul.f32 0.7978846, %v1162_v42 }
 0x259   : > { %v1463_v44 = vpop.eup %1462  ;;  %1468 = vtanh.f32 %v1164_v43 }
 0x25a   : > { %v943_v45 = vadd.f32 1.0, %v1463_v44 }
 0x25b   : > { %v1465_v46 = vpop.eup %1464 }
 0x25c   : > { %v944_v49 = vadd.f32 1.0, %v1465_v46  ;;  %v945_v50 = vmul.f32 %v943_v45, %v929_v47 }
 0x25e   : > { %v946_v51 = vmul.f32 %v944_v49, %v930_v48 }
 0x260   : > { %v947_v53 = vpack.c.bf16 %v946_v51, %v945_v50 }
 0x261   : > { %v1467_v54 = vpop.eup %1466 }
 0x262   : > { %1408 = vmatmul.mubr.msk.bf16.vlgmr.msra.gmra.mrb[0].mxu1 %vm963_vm4, %v947_v53  ;;  %v1167_v55 = vadd.f32 1.0, %v1467_v54 }
 0x263   : > { %1418 = vmatpush3.bf16.msra.mxu1 %v1453_v52  ;;  %1419 = vmatprep.mubr.msk.bf16.mxu1 %vm1495_vm3, %v1494_v32  ;;  %v1469_v56 = vpop.eup %1468  ;;  %v1373_v32 = vld [vmem:[%s1767_s10] ss:$0 sm:$0xff] }
 0x264   : > { %v1168_v59 = vadd.f32 1.0, %v1469_v56  ;;  %v1169_v60 = vmul.f32 %v1167_v55, %v1153_v57 }
 0x266   : > { %v1170_v61 = vmul.f32 %v1168_v59, %v1154_v58 }
 0x268   : > { %v1171_v62 = vpack.c.bf16 %v1170_v61, %v1169_v60 }
 0x26a   : > { %1420 = vmatmul.mubr.msk.bf16.vlgmr.msra.gmra.mrb[4].mxu1 %vm963_vm4, %v1171_v62 }
 0x335   : > { %v1001_v63 = vpop.f32.mrb[0].mxu1 }
 0x336   : > { %v1409_v1 = vpop.f32.mrb[1].mxu1  ;;  %v1002_v4 = vadd.f32 %v1370_v0, %v1001_v63 }
 0x337   : > { %v1004_v2 = vpop.f32.mrb[2].mxu1 }
 0x338   : > { %v1410_v3 = vpop.f32.mrb[3].mxu1  ;;  %v1005_v5 = vadd.f32 %v1370_v0, %v1004_v2  ;;  %v1015_v7 = vmul.f32 %v1373_v32, %v1002_v4 }
 0x33a   : > { %v1016_v10 = vmul.f32 %v1373_v32, %v1005_v5  ;;  %v1017_v15 = vadd.f32 %v1015_v7, %v1651_v12 }
 0x33c   : > { %v1018_v19 = vadd.f32 %v1016_v10, %v1663_v30 }
 0x33d   : > { %v1224_v8 = vpop.f32.mrb[4].mxu1 }
 0x33e   : > { %v1225_v11 = vadd.f32 %v1382_v6, %v1224_v8  ;;  %v1421_v13 = vpop.f32.mrb[5].mxu1 }
 0x33f   : > { %v1227_v14 = vpop.f32.mrb[6].mxu1 }
 0x340   : > { %v1238_v16 = vmul.f32 %v1385_v9, %v1225_v11  ;;  %v1228_v17 = vadd.f32 %v1382_v6, %v1227_v14  ;;  %v1422_v18 = vpop.f32.mrb[7].mxu1 }
 0x342   : > { %v1240_v20 = vadd.f32 %v1238_v16, %v1017_v15  ;;  %v1239_v21 = vmul.f32 %v1385_v9, %v1228_v17 }
 0x344   : > { %1242 = vst.msk [vmem:[%s732_s26] sm:$0xff] %vm737_vm0, %v1240_v20  ;;  %v1241_v22 = vadd.f32 %v1239_v21, %v1018_v19 }
 0x346   : > { %1243 = vst.msk [vmem:[%s732_s26 + $0x8] sm:$0xff] %vm737_vm0, %v1241_v22 }
 0x347 PF: > { %s1794_s1 = sld [smem:[#allocation4_spill]]  ;;  %s1796_s22 = sld [smem:[#allocation5_spill]] }
 0x34d   : > { %s30_s23 = sadd.s32 1, %s1794_s1   ;;  %s1795_s1 = sld [smem:[#allocation3_spill]] }
 0x34e   : > { %p27_p5 = scmp.ge.s32.totalorder %s30_s23, 4  }
 0x350   :  { %29 = sbr.rel (!%p27_p5) target bundleno = 6 (0x6), region = 133 }

// kernel: tpu_custom_call.1
= control target key start
LH: loop header
LB: loop body
LE: loop exit
PB: predicated region body
PF: predicated region fallthrough
CT: control target
= control target key end

     0   :  { %s1603_s22 = smov 0   ;;  %s1605_s23 = smov 0   ;;  %s1757_s0 = inlined_call_operand.vmem [shape: f32[2,24,4], index: 0, kind: input, shape index: {}]   ;;  %s1758_s1 = inlined_call_operand.vmem [shape: f32[2,24,4], index: 1, kind: input, shape index: {}]   ;;  %s1759_s2 = inlined_call_operand.vmem [shape: f32[7,4], index: 2, kind: input, shape index: {}]   ;;  %s1760_s3 = inlined_call_operand.vmem [shape: f32[1,4], index: 3, kind: input, shape index: {}]   ;;  %s1761_s4 = inlined_call_operand.vmem [shape: f32[1,4], index: 4, kind: input, shape index: {}]   ;;  %s1762_s5 = inlined_call_operand.vmem [shape: f32[1,4], index: 5, kind: input, shape index: {}]   ;;  %s1763_s6 = inlined_call_operand.vmem [shape: bf16[4,16], index: 6, kind: input, shape index: {}]   ;;  %s1764_s7 = inlined_call_operand.vmem [shape: f32[1,16], index: 7, kind: input, shape index: {}]   ;;  %s1765_s8 = inlined_call_operand.vmem [shape: bf16[16,4], index: 8, kind: input, shape index: {}]   ;;  %s1766_s9 = inlined_call_operand.vmem [shape: f32[1,4], index: 9, kind: input, shape index: {}]   ;;  %s1767_s10 = inlined_call_operand.vmem [shape: f32[1,4], index: 10, kind: input, shape index: {}]   ;;  %s1768_s11 = inlined_call_operand.vmem [shape: f32[3,4], index: 11, kind: input, shape index: {}]   ;;  %s1769_s12 = inlined_call_operand.vmem [shape: f32[1,4], index: 12, kind: input, shape index: {}]   ;;  %s1770_s13 = inlined_call_operand.vmem [shape: f32[1,4], index: 13, kind: input, shape index: {}]   ;;  %s1771_s14 = inlined_call_operand.vmem [shape: f32[1,4], index: 14, kind: input, shape index: {}]   ;;  %s1772_s15 = inlined_call_operand.vmem [shape: bf16[4,16], index: 15, kind: input, shape index: {}]   ;;  %s1773_s16 = inlined_call_operand.vmem [shape: f32[1,16], index: 16, kind: input, shape index: {}]   ;;  %s1774_s17 = inlined_call_operand.vmem [shape: bf16[16,4], index: 17, kind: input, shape index: {}]   ;;  %s1775_s18 = inlined_call_operand.vmem [shape: f32[1,4], index: 18, kind: input, shape index: {}]   ;;  %s1776_s19 = inlined_call_operand.vmem [shape: f32[1,4], index: 19, kind: input, shape index: {}]   ;;  %s1777_s20 = inlined_call_operand.vmem [shape: f32[2,16,4], index: 20, kind: output, shape index: {}]  }
   0x1   :  { %1781 = sst [smem:[#allocation6_spill]] %s1757_s0 }
   0x2   :  { %1782 = sst [smem:[#allocation7_spill]] %s1758_s1  ;;  %s1601_s1 = smov 0  }
   0x3   :  { %1783 = sst [smem:[#allocation8_spill]] %s1759_s2 }
   0x4   :  { %1784 = sst [smem:[#allocation9_spill]] %s1760_s3 }
   0x5   :  { %1785 = sst [smem:[#allocation10_spill]] %s1761_s4 }
   0x6 LB: > { %1786 = sst [smem:[#allocation3_spill]] %s1488_s22  ;;  %s42_s24 = sadd.s32 1, %s1488_s22  ;;  %s1492_s23 = sphi %s1605_s23, %s30_s23   ;;  %s1488_s22 = sphi %s1603_s22, %s1796_s22   ;;  %s1484_s1 = sphi %s1601_s1, %s1795_s1  }
   0x7   : > { %1787 = sst [smem:[#allocation4_spill]] %s1492_s23  ;;  %p1353_p0 = scmp.ge.s32.totalorder %s1492_s23, 1 }
   0x8   : > { %p44_p1 = scmp.ge.s32.totalorder %s42_s24, 2  ;;  %p614_p2 = scmp.lt.s32.totalorder %s1492_s23, 3 }
   0xa   : > { %s1798_s24 = smov (%p44_p1, %s42_s24), 0  ;;  %p615_p3 = pnand %p1353_p0, %p614_p2 }
   0xb   : > { %1788 = sst [smem:[#allocation5_spill]] %s1798_s24  ;;  %p699_p4 = scmp.lt.s32.totalorder (!%p615_p3), %s1484_s1, 1  ;;  %vm737_vm0 = vcmask (!%p615_p3), 31744   ;;  %vm741_vm1 = vcmask (!%p615_p3), 29696   ;;  %v1375_v7 = vld [vmem:[%s1768_s11] ss:$0 sm:$0xff] (!%p615_p3) }
   0xc   : > { %618 = sbr.rel (%p615_p3) target bundleno = 839 (0x347), region = 100  ;;  %s1789_s26 = sld [smem:[#allocation6_spill]] (!%p615_p3)  ;;  %v1376_v8 = vld [vmem:[%s1768_s11 + $0x1] ss:$0 sm:$0xff] (!%p615_p3)  ;;  %v1374_v11 = vld [vmem:[%s1769_s12] ss:$0 sm:$0xff] (!%p615_p3) }
   0xd   : > { %s1790_s30 = sld [smem:[#allocation7_spill]] (!%p615_p3)  ;;  %s1791_s22 = sld [smem:[#allocation9_spill]] (!%p615_p3)  ;;  %v1377_v16 = vld [vmem:[%s1768_s11 + $0x2] ss:$0 sm:$0xff] (!%p615_p3)  ;;  %vm884_vm2 = vcmask (!%p615_p3), 1041408   ;;  %vm1495_vm3 = vmmov (!%p615_p3), 0  }
   0xe   : > { %s1793_s25 = sld [smem:[#allocation10_spill]] (!%p615_p3)  ;;  %vm963_vm4 = vcmask (!%p615_p3), 130048  }
  0x13   : > { %s1800_s1 = smov (!%p699_p4, %s1484_s1), 1  ;;  %v1358_v3 = vld [vmem:[%s1791_s22] ss:$0 sm:$0xff] }
  0x14   : > { %s1423_s2 = smul.u32 24, %s1800_s1  ;;  %s1390_s21 = sshll.u32 %s1800_s1, 4 }
  0x16   : > { %s706_s27 = scalar_lea.vmem %s1789_s26, %s1423_s2  ;;  %s1389_s28 = sadd.s32 16, %s1423_s2 }
  0x17   : > { %v735_v0 = vld [vmem:[%s706_s27] sm:$0xff]  ;;  %v736_v1 = vld [vmem:[%s706_s27 + $0x8] sm:$0xff]  ;;  %s721_s0 = scalar_lea.vmem %s1790_s30, %s1389_s28  ;;  %s1792_s2 = sld [smem:[#allocation8_spill]] }
  0x18   : > { %738 = vst.msk [vmem:[#allocation2] sm:$0xff] %vm737_vm0, %v735_v0  ;;  %739 = vst.msk [vmem:[#allocation2 + $0x8] sm:$0xff] %vm737_vm0, %v736_v1  ;;  %v740_v2 = vld [vmem:[%s721_s0] sm:$0x3f]  ;;  %s732_s26 = scalar_lea.vmem %s1777_s20, %s1390_s21 }
  0x19   : > { %742 = vst.msk [vmem:[#allocation2 + $0x10] sm:$0x3f] %vm741_vm1, %v740_v2 }
  0x1d   : > { %v1359_v4 = vld [vmem:[%s1792_s2] ss:$0 sm:$0xff]  ;;  %v1360_v5 = vld [vmem:[%s1792_s2 + $0x1] ss:$0 sm:$0xff]  ;;  %v1361_v6 = vld [vmem:[%s1792_s2 + $0x2] ss:$0 sm:$0xff] }
  0x1e   : > { %v1362_v17 = vld [vmem:[%s1792_s2 + $0x3] ss:$0 sm:$0xff]  ;;  %v1363_v27 = vld [vmem:[%s1792_s2 + $0x4] ss:$0 sm:$0xff]  ;;  %v1364_v37 = vld [vmem:[%s1792_s2 + $0x5] ss:$0 sm:$0xff] }
  0x1f   : > { %v752_v9 = vld [vmem:[#allocation2] sm:$0xff]  ;;  %v753_v20 = vld [vmem:[#allocation2 + $0x8] sm:$0xff] }
  0x20   : > { %v763_v10 = vld [vmem:[#allocation2 + $0x1] sm:$0xff]  ;;  %v759_v13 = vmul.f32 %v1359_v4, %v752_v9  ;;  %v760_v24 = vmul.f32 %v1359_v4, %v753_v20  ;;  %v764_v25 = vld [vmem:[#allocation2 + $0x9] sm:$0xff] }
  0x21   : > { %v1651_v12 = vld [vmem:[#allocation2 + $0x3] sm:$0xff]  ;;  %v770_v14 = vmul.f32 %v1360_v5, %v763_v10  ;;  %v1663_v30 = vld [vmem:[#allocation2 + $0xb] sm:$0xff]  ;;  %v771_v31 = vmul.f32 %v1360_v5, %v764_v25 }
  0x22   : > { %v774_v15 = vld [vmem:[#allocation2 + $0x2] sm:$0xff]  ;;  %v1040_v19 = vmul.f32 %v1376_v8, %v1651_v12  ;;  %v761_v21 = vadd.f32 %v1358_v3, %v759_v13  ;;  %v775_v26 = vld [vmem:[#allocation2 + $0xa] sm:$0xff]  ;;  %v790_v33 = vmul.f32 %v1362_v17, %v1651_v12  ;;  %v762_v34 = vadd.f32 %v1358_v3, %v760_v24 }
  0x23   : > { %v1031_v18 = vmul.f32 %v1375_v7, %v774_v15  ;;  %v781_v22 = vmul.f32 %v1361_v6, %v774_v15  ;;  %v794_v23 = vld [vmem:[#allocation2 + $0x4] sm:$0xff]  ;;  %v782_v35 = vmul.f32 %v1361_v6, %v775_v26  ;;  %v795_v39 = vld [vmem:[#allocation2 + $0xc] sm:$0xff]  ;;  %v1032_v40 = vmul.f32 %v1375_v7, %v775_v26 }
  0x24   : > { %v1049_v29 = vmul.f32 %v1377_v16, %v794_v23  ;;  %v772_v32 = vadd.f32 %v770_v14, %v761_v21  ;;  %v805_v36 = vld [vmem:[#allocation2 + $0x5] sm:$0xff]  ;;  %v1041_v41 = vmul.f32 %v1376_v8, %v1663_v30  ;;  %v801_v43 = vmul.f32 %v1363_v27, %v794_v23  ;;  %v806_v49 = vld [vmem:[#allocation2 + $0xd] sm:$0xff] }
  0x25   : > { %v1033_v28 = vadd.f32 %v1374_v11, %v1031_v18  ;;  %v773_v44 = vadd.f32 %v771_v31, %v762_v34  ;;  %v791_v45 = vmul.f32 %v1362_v17, %v1663_v30  ;;  %v816_v46 = vld [vmem:[#allocation2 + $0x6] sm:$0xff]  ;;  %v1034_v50 = vadd.f32 %v1374_v11, %v1032_v40  ;;  %v817_v57 = vld [vmem:[#allocation2 + $0xe] sm:$0xff]  ;;  %v873_v31 = vld [vmem:[%s1763_s6] sm:$0x3] }
  0x26   : > { %v783_v42 = vadd.f32 %v781_v22, %v772_v32  ;;  %v1365_v47 = vld [vmem:[%s1792_s2 + $0x6] ss:$0 sm:$0xff]  ;;  %v1050_v51 = vmul.f32 %v1377_v16, %v795_v39  ;;  %v812_v53 = vmul.f32 %v1364_v37, %v805_v36  ;;  %v802_v55 = vmul.f32 %v1363_v27, %v795_v39 }
  0x27   : > { %v1042_v38 = vadd.f32 %v1040_v19, %v1033_v28  ;;  %v784_v54 = vadd.f32 %v782_v35, %v773_v44  ;;  %v1043_v58 = vadd.f32 %v1041_v41, %v1034_v50  ;;  %v823_v60 = vmul.f32 %v1365_v47, %v816_v46 }
  0x28   : > { %v792_v52 = vadd.f32 %v790_v33, %v783_v42  ;;  %v813_v62 = vmul.f32 %v1364_v37, %v806_v49  ;;  %v824_v2 = vmul.f32 %v1365_v47, %v817_v57  ;;  %v1494_v32 = vmov 0.0  }
  0x29   : > { %v1051_v48 = vadd.f32 %v1049_v29, %v1042_v38  ;;  %v793_v61 = vadd.f32 %v791_v45, %v784_v54  ;;  %v1052_v63 = vadd.f32 %v1050_v51, %v1043_v58  ;;  %1399 = vmatprep.subr.bf16.mxu0 %v1494_v32  ;;  %v886_v33 = vsel %vm884_vm2, %v873_v31, 0  ;;  %1405 = vmatprep.subr.bf16.mxu1 %v1494_v32 }
  0x2a   : > { %v803_v59 = vadd.f32 %v801_v43, %v792_v52  ;;  %1400 = vmatpush3.bf16.msra.mxu0 %v886_v33  ;;  %1401 = vmatprep.mubr.msk.bf16.mxu0 %vm1495_vm3, %v1494_v32 }
  0x2b   : > { %v1053_v56 = vsel %vm737_vm0, %v1051_v48, 0.0  ;;  %v804_v1 = vadd.f32 %v802_v55, %v793_v61  ;;  %v1056_v3 = vsel %vm737_vm0, %v1052_v63, 0.0  ;;  %1411 = vmatprep.subr.bf16.mxu0 %v1494_v32  ;;  %1407 = vmatprep.mubr.msk.bf16.mxu1 %vm1495_vm3, %v1494_v32  ;;  %v1378_v61 = vld [vmem:[%s1770_s13] ss:$0 sm:$0xff] }
  0x2c   : > { %1054 = vadd.xlane.f32.xlu1 %v1053_v56  ;;  %v814_v0 = vadd.f32 %v812_v53, %v803_v59  ;;  %v1367_v53 = vld [vmem:[%s1762_s5] ss:$0 sm:$0xff] }
  0x2d   : > { %v815_v5 = vadd.f32 %v813_v62, %v804_v1  ;;  %v1098_v56 = vld [vmem:[%s1772_s15] sm:$0x3] }
  0x2e   : > { %v825_v4 = vadd.f32 %v823_v60, %v814_v0 }
  0x2f   : > { %v826_v7 = vadd.f32 %v824_v2, %v815_v5  ;;  %v1379_v2 = vld [vmem:[%s1771_s14] ss:$0 sm:$0xff] }
  0x30   : > { %1057 = vadd.xlane.f32.xlu1 %v1056_v3  ;;  %v827_v6 = vsel %vm737_vm0, %v825_v4, 0.0 }
  0x31   : > { %828 = vadd.xlane.f32.xlu0 %v827_v6  ;;  %v830_v8 = vsel %vm737_vm0, %v826_v7, 0.0  ;;  %v1452_v6 = vld [vmem:[%s1765_s8] sm:$0xff]  }
  0x32   : > { %1406 = vmatpush3.bf16.msra.mxu1 %v1452_v6  ;;  %v1382_v6 = vld [vmem:[%s1775_s18] ss:$0 sm:$0xff] }
  0x33   : > { %1417 = vmatprep.subr.bf16.mxu1 %v1494_v32 }
  0x35   : > { %831 = vadd.xlane.f32.xlu0 %v830_v8 }
  0xb9   : > { %v1055_v9 = vpop.xlane.xlu1 %1054 }
  0xba   : > { %v1059_v10 = vmul.f32 0.25, %v1055_v9 }
  0xbc   : > { %v1061_v15 = vsub.f32 %v1051_v48, %v1059_v10  ;;  %v1366_v48 = vld [vmem:[%s1793_s25] ss:$0 sm:$0xff] }
  0xbd   : > { %v1058_v11 = vpop.xlane.xlu1 %1057 }
  0xbe   : > { %v829_v13 = vpop.xlane.xlu0 %828  ;;  %v1060_v16 = vmul.f32 0.25, %v1058_v11  ;;  %v1063_v22 = vmul.f32 %v1061_v15, %v1061_v15 }
  0xbf   : > { %v834_v14 = vmul.f32 0.25, %v829_v13 }
  0xc0   : > { %v1062_v20 = vsub.f32 %v1052_v63, %v1060_v16  ;;  %v1065_v25 = vsel %vm737_vm0, %v1063_v22, 0.0  ;;  %v1110_v63 = vsel %vm884_vm2, %v1098_v56, 0 }
  0xc1   : > { %v836_v17 = vsub.f32 %v825_v4, %v834_v14 }
  0xc2   : > { %v832_v18 = vpop.xlane.xlu0 %831  ;;  %v1064_v27 = vmul.f32 %v1062_v20, %v1062_v20 }
  0xc3   : > { %v835_v19 = vmul.f32 0.25, %v832_v18  ;;  %v838_v21 = vmul.f32 %v836_v17, %v836_v17  ;;  %v1380_v18 = vld [vmem:[%s1773_s16] ss:$0 sm:$0xff] }
  0xc4   : > { %v1068_v29 = vsel %vm737_vm0, %v1064_v27, 0.0 }
  0xc5   : > { %v837_v23 = vsub.f32 %v826_v7, %v835_v19  ;;  %v840_v24 = vsel %vm737_vm0, %v838_v21, 0.0  ;;  %v1368_v7 = vld [vmem:[%s1764_s7] ss:$0 sm:$0xff] }
  0xc6   : > { %841 = vadd.xlane.f32.xlu0 %v840_v24 }
  0xc7   : > { %v839_v26 = vmul.f32 %v837_v23, %v837_v23 }
  0xc9   : > { %v843_v28 = vsel %vm737_vm0, %v839_v26, 0.0 }
  0xca   : > { %1066 = vadd.xlane.f32.xlu0 %v1065_v25  ;;  %844 = vadd.xlane.f32.xlu1 %v843_v28 }
  0xce   : > { %1069 = vadd.xlane.f32.xlu1 %v1068_v29 }
 0x153   : > { %v842_v34 = vpop.xlane.xlu0 %841 }
 0x154   : > { %v846_v35 = vmul.f32 0.25, %v842_v34 }
 0x156   : > { %v848_v36 = vadd.f32 1e-06, %v846_v35 }
 0x157   : > { %v845_v37 = vpop.xlane.xlu1 %844  ;;  %v1067_v38 = vpop.xlane.xlu0 %1066 }
 0x158   : > { %1454 = vrsqrt.f32 %v848_v36  ;;  %v847_v39 = vmul.f32 0.25, %v845_v37  ;;  %v1071_v40 = vmul.f32 0.25, %v1067_v38 }
 0x15a   : > { %v849_v41 = vadd.f32 1e-06, %v847_v39  ;;  %v1073_v42 = vadd.f32 1e-06, %v1071_v40 }
 0x15b   : > { %v1070_v43 = vpop.xlane.xlu1 %1069 }
 0x15c   : > { %1456 = vrsqrt.f32 %v849_v41  ;;  %v1072_v44 = vmul.f32 0.25, %v1070_v43 }
 0x15d   : > { %1458 = vrsqrt.f32 %v1073_v42 }
 0x15e   : > { %v1074_v45 = vadd.f32 1e-06, %v1072_v44 }
 0x160   : > { %1460 = vrsqrt.f32 %v1074_v45 }
 0x162   : > { %v1455_v46 = vpop.eup %1454 }
 0x163   : > { %v852_v47 = vmul.f32 %v1455_v46, %v836_v17 }
 0x165   : > { %v861_v51 = vmul.f32 %v1366_v48, %v852_v47 }
 0x166   : > { %v1457_v49 = vpop.eup %1456 }
 0x167   : > { %v853_v50 = vmul.f32 %v1457_v49, %v837_v23  ;;  %v1459_v52 = vpop.eup %1458  ;;  %v870_v59 = vadd.f32 %v1367_v53, %v861_v51 }
 0x168   : > { %v1077_v57 = vmul.f32 %v1459_v52, %v1061_v15  ;;  %v1453_v52 = vld [vmem:[%s1774_s17] sm:$0xff]  }
 0x169   : > { %v862_v54 = vmul.f32 %v1366_v48, %v853_v50 }
 0x16a   : > { %v1461_v55 = vpop.eup %1460  ;;  %v1086_v1 = vmul.f32 %v1378_v61, %v1077_v57 }
 0x16b   : > { %v1078_v58 = vmul.f32 %v1461_v55, %v1062_v20  ;;  %v871_v60 = vadd.f32 %v1367_v53, %v862_v54 }
 0x16c   : > { %v1095_v4 = vadd.f32 %v1379_v2, %v1086_v1 }
 0x16d   : > { %v1087_v62 = vmul.f32 %v1378_v61, %v1078_v58  ;;  %v872_v0 = vpack.c.bf16 %v871_v60, %v870_v59 }
 0x16f   : > { %1402 = vmatmul.mubr.msk.bf16.vlgmr.msra.gmra.mrb[0].mxu0 %vm737_vm0, %v872_v0  ;;  %v1096_v3 = vadd.f32 %v1379_v2, %v1087_v62  ;;  %v1370_v0 = vld [vmem:[%s1766_s9] ss:$0 sm:$0xff] }
 0x170   : > { %1412 = vmatpush3.bf16.msra.mxu0 %v1110_v63  ;;  %1413 = vmatprep.mubr.msk.bf16.mxu0 %vm1495_vm3, %v1494_v32 }
 0x171   : > { %v1097_v5 = vpack.c.bf16 %v1096_v3, %v1095_v4 }
 0x177   : > { %1414 = vmatmul.mubr.msk.bf16.vlgmr.msra.gmra.mrb[4].mxu0 %vm737_vm0, %v1097_v5 }
 0x242   : > { %v922_v8 = vpop.f32.mrb[0].mxu0 }
 0x243   : > { %v923_v9 = vadd.f32 %v1368_v7, %v922_v8  ;;  %v1403_v10 = vpop.f32.mrb[1].mxu0 }
 0x244   : > { %v925_v11 = vpop.f32.mrb[2].mxu0 }
 0x245   : > { %v931_v13 = vmul.f32 0.044715, %v923_v9  ;;  %v926_v14 = vadd.f32 %v1368_v7, %v925_v11  ;;  %v1404_v15 = vpop.f32.mrb[3].mxu0  ;;  %v929_v47 = vmul.f32 0.5, %v923_v9 }
 0x247   : > { %v933_v16 = vmul.f32 %v931_v13, %v923_v9  ;;  %v932_v17 = vmul.f32 0.044715, %v926_v14  ;;  %v930_v48 = vmul.f32 0.5, %v926_v14 }
 0x249   : > { %v935_v19 = vmul.f32 %v933_v16, %v923_v9  ;;  %v934_v20 = vmul.f32 %v932_v17, %v926_v14 }
 0x24a   : > { %v1146_v21 = vpop.f32.mrb[4].mxu0 }
 0x24b   : > { %v937_v22 = vadd.f32 %v935_v19, %v923_v9  ;;  %v936_v23 = vmul.f32 %v934_v20, %v926_v14  ;;  %v1147_v24 = vadd.f32 %v1380_v18, %v1146_v21  ;;  %v1415_v25 = vpop.f32.mrb[5].mxu0  ;;  %v1385_v9 = vld [vmem:[%s1776_s19] ss:$0 sm:$0xff] }
 0x24c   : > { %v1149_v26 = vpop.f32.mrb[6].mxu0 }
 0x24d   : > { %v939_v27 = vmul.f32 0.7978846, %v937_v22  ;;  %v938_v28 = vadd.f32 %v936_v23, %v926_v14  ;;  %v1155_v29 = vmul.f32 0.044715, %v1147_v24  ;;  %v1416_v31 = vpop.f32.mrb[7].mxu0  ;;  %v1150_v33 = vadd.f32 %v1380_v18, %v1149_v26 }
 0x24e   : > { %v1153_v57 = vmul.f32 0.5, %v1147_v24 }
 0x24f   : > { %1462 = vtanh.f32 %v939_v27  ;;  %v940_v34 = vmul.f32 0.7978846, %v938_v28  ;;  %v1157_v35 = vmul.f32 %v1155_v29, %v1147_v24  ;;  %v1156_v36 = vmul.f32 0.044715, %v1150_v33 }
 0x250   : > { %v1154_v58 = vmul.f32 0.5, %v1150_v33 }
 0x251   : > { %1464 = vtanh.f32 %v940_v34  ;;  %v1159_v37 = vmul.f32 %v1157_v35, %v1147_v24  ;;  %v1158_v38 = vmul.f32 %v1156_v36, %v1150_v33 }
 0x253   : > { %v1161_v39 = vadd.f32 %v1159_v37, %v1147_v24  ;;  %v1160_v40 = vmul.f32 %v1158_v38, %v1150_v33 }
 0x255   : > { %v1163_v41 = vmul.f32 0.7978846, %v1161_v39  ;;  %v1162_v42 = vadd.f32 %v1160_v40, %v1150_v33 }
 0x257   : > { %1466 = vtanh.f32 %v1163_v41  ;;  %v1164_v43 = vmul.f32 0.7978846, %v1162_v42 }
 0x259   : > { %v1463_v44 = vpop.eup %1462  ;;  %1468 = vtanh.f32 %v1164_v43 }
 0x25a   : > { %v943_v45 = vadd.f32 1.0, %v1463_v44 }
 0x25b   : > { %v1465_v46 = vpop.eup %1464 }
 0x25c   : > { %v944_v49 = vadd.f32 1.0, %v1465_v46  ;;  %v945_v50 = vmul.f32 %v943_v45, %v929_v47 }
 0x25e   : > { %v946_v51 = vmul.f32 %v944_v49, %v930_v48 }
 0x260   : > { %v947_v53 = vpack.c.bf16 %v946_v51, %v945_v50 }
 0x261   : > { %v1467_v54 = vpop.eup %1466 }
 0x262   : > { %1408 = vmatmul.mubr.msk.bf16.vlgmr.msra.gmra.mrb[0].mxu1 %vm963_vm4, %v947_v53  ;;  %v1167_v55 = vadd.f32 1.0, %v1467_v54 }
 0x263   : > { %1418 = vmatpush3.bf16.msra.mxu1 %v1453_v52  ;;  %1419 = vmatprep.mubr.msk.bf16.mxu1 %vm1495_vm3, %v1494_v32  ;;  %v1469_v56 = vpop.eup %1468  ;;  %v1373_v32 = vld [vmem:[%s1767_s10] ss:$0 sm:$0xff] }
 0x264   : > { %v1168_v59 = vadd.f32 1.0, %v1469_v56  ;;  %v1169_v60 = vmul.f32 %v1167_v55, %v1153_v57 }
 0x266   : > { %v1170_v61 = vmul.f32 %v1168_v59, %v1154_v58 }
 0x268   : > { %v1171_v62 = vpack.c.bf16 %v1170_v61, %v1169_v60 }
 0x26a   : > { %1420 = vmatmul.mubr.msk.bf16.vlgmr.msra.gmra.mrb[4].mxu1 %vm963_vm4, %v1171_v62 }
 0x335   : > { %v1001_v63 = vpop.f32.mrb[0].mxu1 }
 0x336   : > { %v1409_v1 = vpop.f32.mrb[1].mxu1  ;;  %v1002_v4 = vadd.f32 %v1370_v0, %v1001_v63 }
 0x337   : > { %v1004_v2 = vpop.f32.mrb[2].mxu1 }
 0x338   : > { %v1410_v3 = vpop.f32.mrb[3].mxu1  ;;  %v1005_v5 = vadd.f32 %v1370_v0, %v1004_v2  ;;  %v1015_v7 = vmul.f32 %v1373_v32, %v1002_v4 }
 0x33a   : > { %v1016_v10 = vmul.f32 %v1373_v32, %v1005_v5  ;;  %v1017_v15 = vadd.f32 %v1015_v7, %v1651_v12 }
 0x33c   : > { %v1018_v19 = vadd.f32 %v1016_v10, %v1663_v30 }
 0x33d   : > { %v1224_v8 = vpop.f32.mrb[4].mxu1 }
 0x33e   : > { %v1225_v11 = vadd.f32 %v1382_v6, %v1224_v8  ;;  %v1421_v13 = vpop.f32.mrb[5].mxu1 }
 0x33f   : > { %v1227_v14 = vpop.f32.mrb[6].mxu1 }
 0x340   : > { %v1238_v16 = vmul.f32 %v1385_v9, %v1225_v11  ;;  %v1228_v17 = vadd.f32 %v1382_v6, %v1227_v14  ;;  %v1422_v18 = vpop.f32.mrb[7].mxu1 }
 0x342   : > { %v1240_v20 = vadd.f32 %v1238_v16, %v1017_v15  ;;  %v1239_v21 = vmul.f32 %v1385_v9, %v1228_v17 }
 0x344   : > { %1242 = vst.msk [vmem:[%s732_s26] sm:$0xff] %vm737_vm0, %v1240_v20  ;;  %v1241_v22 = vadd.f32 %v1239_v21, %v1018_v19 }
 0x346   : > { %1243 = vst.msk [vmem:[%s732_s26 + $0x8] sm:$0xff] %vm737_vm0, %v1241_v22 }
 0x347 PF: > { %s1794_s1 = sld [smem:[#allocation4_spill]]  ;;  %s1796_s22 = sld [smem:[#allocation5_spill]] }
 0x34d   : > { %s30_s23 = sadd.s32 1, %s1794_s1   ;;  %s1795_s1 = sld [smem:[#allocation3_spill]] }
 0x34e   : > { %p27_p5 = scmp.ge.s32.totalorder %s30_s23, 4  }
 0x350   :  { %29 = sbr.rel (!%p27_p5) target bundleno = 6 (0x6), region = 133 }

</bundles_post_ra>
